<compile_context>
chip_gen: v7x
topology: tpu7x:2x2x1
jax: 0.10.0
libtpu: 0.0.40
codegen_flags: <defaults>
</compile_context>

<pallas_src>
import jax
import jax.numpy as jnp
from jax.experimental import pallas as pl
from jax.experimental.pallas import tpu as pltpu

LN_EPS = 1e-7  # DebertaLayerNorm default variance_epsilon

_WEIGHT_KEYS = ("wq", "bq", "wk", "bk", "wv", "bv",
                "wo", "bo", "ln1_g", "ln1_b",
                "w1", "bf1", "w2", "bf2", "ln2_g", "ln2_b")


if hasattr(pl, "reciprocal"):
    def _recip(x):
        return pl.reciprocal(x, approx=True)   # EUP slot
else:                                          # fallback for older jax
    def _recip(x):
        return 1.0 / x


def _erf(x):
    # Abramowitz & Stegun 7.1.26 rational approximation, |err| < 1.5e-7.
    a1, a2, a3, a4, a5 = 0.254829592, -0.284496736, 1.421413741, -1.453152027, 1.061405429
    p = 0.3275911
    ax = jnp.abs(x)
    t = _recip(1.0 + p * ax)
    poly = ((((a5 * t + a4) * t + a3) * t + a2) * t + a1) * t
    y = 1.0 - poly * jnp.exp(-ax * ax)
    return jnp.where(x >= 0, y, -y)


def _gelu(x):
    # erf-based GELU, matching transformers' ACT2FN["gelu"] (up to approx error)
    return 0.5 * x * (1.0 + _erf(x * 0.7071067811865476))


def _layer_norm(x, gamma, beta):
    # DebertaLayerNorm: stats in float32, then scale/shift.
    x32 = x.astype(jnp.float32)
    mean = jnp.mean(x32, axis=-1, keepdims=True)
    var = jnp.mean((x32 - mean) ** 2, axis=-1, keepdims=True)
    normed = (x32 - mean) * jax.lax.rsqrt(var + LN_EPS)
    return gamma * normed + beta


# ---------------------------------------------------------------------------
# Fused per-(batch, seq-tile) kernel:
#   QKV proj -> per-head softmax attention (context kept in registers/VMEM)
#   -> out_proj + residual + LN -> FFN (GELU) + residual + LN
# ---------------------------------------------------------------------------
def _make_kernel(num_heads, head_dim, has_mask, has_hmask, want_probs):
    def kernel(*refs):
        it = iter(refs)
        h_ref = next(it)
        vis_ref = next(it)
        mask_ref = next(it) if has_mask else None
        hmask_ref = next(it) if has_hmask else None
        (wq_ref, bq_ref, wk_ref, bk_ref, wv_ref, bv_ref,
         wo_ref, bo_ref, g1_ref, b1_ref,
         w1_ref, bf1_ref, w2_ref, bf2_ref, g2_ref, b2_ref) = (
            next(it) for _ in range(16))
        out_ref = next(it)
        probs_ref = next(it) if want_probs else None

        h = h_ref[0]            # (TS, H) f32, also the first residual
        vis = vis_ref[0]        # (P, H)
        h16 = h.astype(jnp.bfloat16)
        vis16 = vis.astype(jnp.bfloat16)

        # Fused QKV projections: lane-dense over the full hidden dim.
        # head_dim**-0.5 already folded into wq / bq.
        q = (jnp.dot(h16, wq_ref[...], preferred_element_type=jnp.float32)
             + bq_ref[...]).astype(jnp.bfloat16)        # (TS, H)
        k = (jnp.dot(vis16, wk_ref[...], preferred_element_type=jnp.float32)
             + bk_ref[...]).astype(jnp.bfloat16)        # (P, H)
        v = (jnp.dot(vis16, wv_ref[...], preferred_element_type=jnp.float32)
             + bv_ref[...]).astype(jnp.bfloat16)        # (P, H)

        mask = mask_ref[0] if has_mask else None        # (TS, P) f32

        ctx_parts = []
        for hi in range(num_heads):                     # unrolled head loop
            lo = hi * head_dim
            qh = q[:, lo:lo + head_dim]                 # (TS, hd) bf16
            kh = k[:, lo:lo + head_dim]                 # (P, hd)  bf16
            vh = v[:, lo:lo + head_dim]                 # (P, hd)  bf16

            scores = jax.lax.dot_general(
                qh, kh, (((1,), (1,)), ((), ())),
                preferred_element_type=jnp.float32)     # (TS, P) f32
            if has_mask:
                scores = scores + mask

            m = jnp.max(scores, axis=-1, keepdims=True)
            e = jnp.exp(scores - m)
            probs = e * _recip(jnp.sum(e, axis=-1, keepdims=True))
            if has_hmask:
                probs = probs * hmask_ref[hi]           # (1,1) broadcast
            # attention-prob dropout: identity in eval mode
            if want_probs:
                probs_ref[0, hi] = probs.astype(probs_ref.dtype)

            ctx_parts.append(jnp.dot(probs.astype(jnp.bfloat16), vh,
                                     preferred_element_type=jnp.float32))
        ctx = jnp.concatenate(ctx_parts, axis=-1)       # (TS, H) f32, heads on lanes

        # out-proj + residual + LayerNorm
        attn_out = (jnp.dot(ctx.astype(jnp.bfloat16), wo_ref[...],
                            preferred_element_type=jnp.float32) + bo_ref[...])
        # hidden dropout: identity in eval mode
        h1 = _layer_norm(attn_out + h, g1_ref[...], b1_ref[...])

        # FFN + residual + LayerNorm
        ff = (jnp.dot(h1.astype(jnp.bfloat16), w1_ref[...],
                      preferred_element_type=jnp.float32) + bf1_ref[...])
        ff = _gelu(ff)
        # hidden dropout: identity in eval mode
        ff = (jnp.dot(ff.astype(jnp.bfloat16), w2_ref[...],
                      preferred_element_type=jnp.float32) + bf2_ref[...])
        out = _layer_norm(ff + h1, g2_ref[...], b2_ref[...])

        out_ref[0] = out.astype(out_ref.dtype)

    return kernel


def _pick_seq_tile(S):
    # Bound the per-step (TS, intermediate) GELU buffer and give the pipeline
    # several steps to overlap; fall back to whole-S when nothing divides.
    for t in (512, 256, 128):
        if S % t == 0:
            return t
    return S


# ---------------------------------------------------------------------------
# Wrapper
# ---------------------------------------------------------------------------
def visual_cross_attention_layer(hidden_states, visual_states, params,
                                 attention_mask=None, layer_head_mask=None,
                                 output_attentions=False,
                                 vmem_limit_bytes=None):
    B, S, H = hidden_states.shape
    _, P, _ = visual_states.shape
    NH = params["num_heads"]
    hd = H // NH

    TS = _pick_seq_tile(S)
    n_s = S // TS

    has_mask = attention_mask is not None
    has_hmask = layer_head_mask is not None
    want_probs = bool(output_attentions)

    # visual_states dropout: identity in eval mode

    in_arrays = [hidden_states, visual_states]
    in_specs = [pl.BlockSpec((1, TS, H), lambda b, s: (b, s, 0)),
                pl.BlockSpec((1, P, H), lambda b, s: (b, 0, 0))]

    if has_mask:
        m = jnp.asarray(attention_mask, jnp.float32)
        if m.ndim == 4:                 # HF-style (B, 1, S, P) / (B, 1, 1, P)
            m = m[:, 0]
        m = jnp.broadcast_to(m, (B, S, P))
        in_arrays.append(m)
        in_specs.append(pl.BlockSpec((1, TS, P), lambda b, s: (b, s, 0)))

    if has_hmask:
        hm = jnp.asarray(layer_head_mask, jnp.float32).reshape(NH, 1, 1)
        in_arrays.append(hm)
        in_specs.append(pl.BlockSpec((NH, 1, 1), lambda b, s: (0, 0, 0)))

    for name in _WEIGHT_KEYS:           # weights: constant index_map (resident)
        w = params[name]
        in_arrays.append(w)
        in_specs.append(pl.BlockSpec(w.shape, lambda b, s, nd=w.ndim: (0,) * nd))

    out_shape = [jax.ShapeDtypeStruct((B, S, H), hidden_states.dtype)]
    out_specs = [pl.BlockSpec((1, TS, H), lambda b, s: (b, s, 0))]
    if want_probs:
        out_shape.append(jax.ShapeDtypeStruct((B, NH, S, P), jnp.float32))
        out_specs.append(pl.BlockSpec((1, NH, TS, P), lambda b, s: (b, 0, s, 0)))

    cp = dict(dimension_semantics=("parallel", "parallel"))
    if vmem_limit_bytes is not None:
        # Raise above the 16/32 MiB scoped default (v5e/v6e) when the resident
        # bf16 FFN weights + (TS, I) intermediate need it; keep below physical
        # VMEM (64 MiB on v7x) or tile the intermediate dim instead.
        cp["vmem_limit_bytes"] = int(vmem_limit_bytes)

    call = pl.pallas_call(
        _make_kernel(NH, hd, has_mask, has_hmask, want_probs),
        grid=(B, n_s),
        in_specs=in_specs,
        out_specs=tuple(out_specs) if want_probs else out_specs[0],
        out_shape=tuple(out_shape) if want_probs else out_shape[0],
        compiler_params=pltpu.CompilerParams(**cp),
    )
    result = call(*in_arrays)

    if want_probs:
        out, probs = result
        return out, probs
    return result


# ---------------------------------------------------------------------------
# Deterministic parameter init (shapes per module __init__; synthetic values)
# ---------------------------------------------------------------------------
def init_params(key, hidden_size, num_heads, intermediate_size):
    hd = hidden_size // num_heads
    scale = float(hd) ** -0.5
    ks = jax.random.split(key, 12)
    H, I = hidden_size, intermediate_size

    def mat(k, fi, fo):   # already transposed vs torch nn.Linear -> y = x @ W + b
        return jax.random.normal(k, (fi, fo), jnp.float32) * 0.02

    def vec(k, n):
        return jax.random.normal(k, (n,), jnp.float32) * 0.02

    params = {
        "num_heads": num_heads,
        # BartAttention scales q by head_dim**-0.5 -> fold into Wq / bq here.
        "wq": (mat(ks[0], H, H) * scale).astype(jnp.bfloat16),
        "bq": (vec(ks[3], H) * scale).reshape(1, H),
        "wk": mat(ks[1], H, H).astype(jnp.bfloat16),
        "bk": vec(ks[4], H).reshape(1, H),
        "wv": mat(ks[2], H, H).astype(jnp.bfloat16),
        "bv": vec(ks[5], H).reshape(1, H),
        "wo": mat(ks[6], H, H).astype(jnp.bfloat16),
        "bo": vec(ks[7], H).reshape(1, H),
        "ln1_g": jnp.ones((1, H), jnp.float32),
        "ln1_b": jnp.zeros((1, H), jnp.float32),
        "w1": mat(ks[8], H, I).astype(jnp.bfloat16),
        "bf1": vec(ks[9], I).reshape(1, I),
        "w2": mat(ks[10], I, H).astype(jnp.bfloat16),
        "bf2": vec(ks[11], H).reshape(1, H),
        "ln2_g": jnp.ones((1, H), jnp.float32),
        "ln2_b": jnp.zeros((1, H), jnp.float32),
    }
    return params


if __name__ == "__main__":
    B, S, P = 2, 8, 16          # batch, seqlen, n_ctx_img_patches
    H, NH, I = 32, 4, 64        # hidden_size, num_attention_heads, intermediate_size

    key = jax.random.PRNGKey(0)
    k_h, k_v, k_p, k_m = jax.random.split(key, 4)
    hidden_states = jax.random.normal(k_h, (B, S, H), jnp.float32)
    visual_states = jax.random.normal(k_v, (B, P, H), jnp.float32)
    params = init_params(k_p, H, NH, I)

    # 1) fast path: no mask, no head mask, no attention-probs output
    out = visual_cross_attention_layer(hidden_states, visual_states, params)
    out = jax.block_until_ready(out)
    assert out.shape == (B, S, H)

    # 2) full path: HF-style additive mask + head mask + output_attentions
    attn_mask = jnp.where(jax.random.uniform(k_m, (B, 1, 1, P)) > 0.2,
                          0.0, -1e9).astype(jnp.float32)
    head_mask = jnp.ones((NH,), jnp.float32)
    out2, probs = visual_cross_attention_layer(
        hidden_states, visual_states, params,
        attention_mask=attn_mask, layer_head_mask=head_mask,
        output_attentions=True)
    out2 = jax.block_until_ready(out2)
    assert out2.shape == (B, S, H)
    assert probs.shape == (B, NH, S, P)

    print("KERNEL_OK")
</pallas_src>

<mosaic_0001>
module attributes {stable_mosaic.version = 11 : i64} {
  func.func @kernel(%arg0: i32, %arg1: i32, %arg2: memref<1x8x32xf32, #tpu.memory_space<vmem>>, %arg3: memref<1x16x32xf32, #tpu.memory_space<vmem>>, %arg4: memref<32x32xbf16, #tpu.memory_space<vmem>>, %arg5: memref<1x32xf32, #tpu.memory_space<vmem>>, %arg6: memref<32x32xbf16, #tpu.memory_space<vmem>>, %arg7: memref<1x32xf32, #tpu.memory_space<vmem>>, %arg8: memref<32x32xbf16, #tpu.memory_space<vmem>>, %arg9: memref<1x32xf32, #tpu.memory_space<vmem>>, %arg10: memref<32x32xbf16, #tpu.memory_space<vmem>>, %arg11: memref<1x32xf32, #tpu.memory_space<vmem>>, %arg12: memref<1x32xf32, #tpu.memory_space<vmem>>, %arg13: memref<1x32xf32, #tpu.memory_space<vmem>>, %arg14: memref<32x64xbf16, #tpu.memory_space<vmem>>, %arg15: memref<1x64xf32, #tpu.memory_space<vmem>>, %arg16: memref<64x32xbf16, #tpu.memory_space<vmem>>, %arg17: memref<1x32xf32, #tpu.memory_space<vmem>>, %arg18: memref<1x32xf32, #tpu.memory_space<vmem>>, %arg19: memref<1x32xf32, #tpu.memory_space<vmem>>, %arg20: memref<1x8x32xf32, #tpu.memory_space<vmem>>) attributes {dimension_semantics = [#tpu.dimension_semantics<parallel>, #tpu.dimension_semantics<parallel>], iteration_bounds = array<i64: 2, 1>, scalar_prefetch = 0 : i64, scratch_operands = 0 : i64, tpu.core_type = #tpu.core_type<tc>, window_params = [{transform_indices = @transform_0, window_bounds = array<i64: 1, 8, 32>}, {transform_indices = @transform_1, window_bounds = array<i64: 1, 16, 32>}, {pipeline_mode = #tpu.pipeline_mode<synchronous>, transform_indices = @transform_2, window_bounds = array<i64: 32, 32>}, {pipeline_mode = #tpu.pipeline_mode<synchronous>, transform_indices = @transform_3, window_bounds = array<i64: 1, 32>}, {pipeline_mode = #tpu.pipeline_mode<synchronous>, transform_indices = @transform_4, window_bounds = array<i64: 32, 32>}, {pipeline_mode = #tpu.pipeline_mode<synchronous>, transform_indices = @transform_5, window_bounds = array<i64: 1, 32>}, {pipeline_mode = #tpu.pipeline_mode<synchronous>, transform_indices = @transform_6, window_bounds = array<i64: 32, 32>}, {pipeline_mode = #tpu.pipeline_mode<synchronous>, transform_indices = @transform_7, window_bounds = array<i64: 1, 32>}, {pipeline_mode = #tpu.pipeline_mode<synchronous>, transform_indices = @transform_8, window_bounds = array<i64: 32, 32>}, {pipeline_mode = #tpu.pipeline_mode<synchronous>, transform_indices = @transform_9, window_bounds = array<i64: 1, 32>}, {pipeline_mode = #tpu.pipeline_mode<synchronous>, transform_indices = @transform_10, window_bounds = array<i64: 1, 32>}, {pipeline_mode = #tpu.pipeline_mode<synchronous>, transform_indices = @transform_11, window_bounds = array<i64: 1, 32>}, {pipeline_mode = #tpu.pipeline_mode<synchronous>, transform_indices = @transform_12, window_bounds = array<i64: 32, 64>}, {pipeline_mode = #tpu.pipeline_mode<synchronous>, transform_indices = @transform_13, window_bounds = array<i64: 1, 64>}, {pipeline_mode = #tpu.pipeline_mode<synchronous>, transform_indices = @transform_14, window_bounds = array<i64: 64, 32>}, {pipeline_mode = #tpu.pipeline_mode<synchronous>, transform_indices = @transform_15, window_bounds = array<i64: 1, 32>}, {pipeline_mode = #tpu.pipeline_mode<synchronous>, transform_indices = @transform_16, window_bounds = array<i64: 1, 32>}, {pipeline_mode = #tpu.pipeline_mode<synchronous>, transform_indices = @transform_17, window_bounds = array<i64: 1, 32>}, {transform_indices = @transform_18, window_bounds = array<i64: 1, 8, 32>}]} {
    %c0 = arith.constant 0 : index
    %c0_0 = arith.constant 0 : index
    %c0_1 = arith.constant 0 : index
    %0 = vector.load %arg2[%c0, %c0_0, %c0_1] : memref<1x8x32xf32, #tpu.memory_space<vmem>>, vector<1x8x32xf32>
    %1 = vector.shape_cast %0 : vector<1x8x32xf32> to vector<8x32xf32>
    %c0_2 = arith.constant 0 : index
    %c0_3 = arith.constant 0 : index
    %c0_4 = arith.constant 0 : index
    %2 = vector.load %arg3[%c0_2, %c0_3, %c0_4] : memref<1x16x32xf32, #tpu.memory_space<vmem>>, vector<1x16x32xf32>
    %3 = vector.shape_cast %2 : vector<1x16x32xf32> to vector<16x32xf32>
    %4 = arith.truncf %1 : vector<8x32xf32> to vector<8x32xbf16>
    %5 = arith.truncf %3 : vector<16x32xf32> to vector<16x32xbf16>
    %c0_5 = arith.constant 0 : index
    %c0_6 = arith.constant 0 : index
    %6 = vector.load %arg4[%c0_5, %c0_6] : memref<32x32xbf16, #tpu.memory_space<vmem>>, vector<32x32xbf16>
    %cst = arith.constant dense<0.000000e+00> : vector<8x32xf32>
    %7 = tpu.matmul %4, %6, %cst {dimension_numbers = #tpu.dot_dimension_numbers<[1], [0], [0], [1], [0, 0, 1, 1], [], []>} : vector<8x32xbf16>, vector<32x32xbf16>, vector<8x32xf32> -> vector<8x32xf32>
    %c0_7 = arith.constant 0 : index
    %c0_8 = arith.constant 0 : index
    %8 = vector.load %arg5[%c0_7, %c0_8] : memref<1x32xf32, #tpu.memory_space<vmem>>, vector<1x32xf32>
    %9 = vector.broadcast %8 : vector<1x32xf32> to vector<8x32xf32>
    %10 = arith.addf %7, %9 : vector<8x32xf32>
    %11 = arith.truncf %10 : vector<8x32xf32> to vector<8x32xbf16>
    %c0_9 = arith.constant 0 : index
    %c0_10 = arith.constant 0 : index
    %12 = vector.load %arg6[%c0_9, %c0_10] : memref<32x32xbf16, #tpu.memory_space<vmem>>, vector<32x32xbf16>
    %cst_11 = arith.constant dense<0.000000e+00> : vector<16x32xf32>
    %13 = tpu.matmul %5, %12, %cst_11 {dimension_numbers = #tpu.dot_dimension_numbers<[1], [0], [0], [1], [0, 0, 1, 1], [], []>} : vector<16x32xbf16>, vector<32x32xbf16>, vector<16x32xf32> -> vector<16x32xf32>
    %c0_12 = arith.constant 0 : index
    %c0_13 = arith.constant 0 : index
    %14 = vector.load %arg7[%c0_12, %c0_13] : memref<1x32xf32, #tpu.memory_space<vmem>>, vector<1x32xf32>
    %15 = vector.broadcast %14 : vector<1x32xf32> to vector<16x32xf32>
    %16 = arith.addf %13, %15 : vector<16x32xf32>
    %17 = arith.truncf %16 : vector<16x32xf32> to vector<16x32xbf16>
    %c0_14 = arith.constant 0 : index
    %c0_15 = arith.constant 0 : index
    %18 = vector.load %arg8[%c0_14, %c0_15] : memref<32x32xbf16, #tpu.memory_space<vmem>>, vector<32x32xbf16>
    %cst_16 = arith.constant dense<0.000000e+00> : vector<16x32xf32>
    %19 = tpu.matmul %5, %18, %cst_16 {dimension_numbers = #tpu.dot_dimension_numbers<[1], [0], [0], [1], [0, 0, 1, 1], [], []>} : vector<16x32xbf16>, vector<32x32xbf16>, vector<16x32xf32> -> vector<16x32xf32>
    %c0_17 = arith.constant 0 : index
    %c0_18 = arith.constant 0 : index
    %20 = vector.load %arg9[%c0_17, %c0_18] : memref<1x32xf32, #tpu.memory_space<vmem>>, vector<1x32xf32>
    %21 = vector.broadcast %20 : vector<1x32xf32> to vector<16x32xf32>
    %22 = arith.addf %19, %21 : vector<16x32xf32>
    %23 = arith.truncf %22 : vector<16x32xf32> to vector<16x32xbf16>
    %24 = vector.extract_strided_slice %11 {offsets = [0, 0], sizes = [8, 8], strides = [1, 1]} : vector<8x32xbf16> to vector<8x8xbf16>
    %25 = vector.extract_strided_slice %17 {offsets = [0, 0], sizes = [16, 8], strides = [1, 1]} : vector<16x32xbf16> to vector<16x8xbf16>
    %26 = vector.extract_strided_slice %23 {offsets = [0, 0], sizes = [16, 8], strides = [1, 1]} : vector<16x32xbf16> to vector<16x8xbf16>
    %cst_19 = arith.constant dense<0.000000e+00> : vector<8x16xf32>
    %27 = tpu.matmul %24, %25, %cst_19 {dimension_numbers = #tpu.dot_dimension_numbers<[1], [1], [0], [0], [0, 0, 1, 0], [], []>} : vector<8x8xbf16>, vector<16x8xbf16>, vector<8x16xf32> -> vector<8x16xf32>
    %cst_20 = arith.constant dense<0xFF800000> : vector<8xf32>
    %28 = vector.multi_reduction <maximumf>, %27, %cst_20 [1] : vector<8x16xf32> to vector<8xf32>
    %29 = vector.shape_cast %28 : vector<8xf32> to vector<8x1xf32>
    %30 = vector.broadcast %29 : vector<8x1xf32> to vector<8x16xf32>
    %31 = arith.subf %27, %30 : vector<8x16xf32>
    %32 = math.exp %31 : vector<8x16xf32>
    %cst_21 = arith.constant dense<0.000000e+00> : vector<8xf32>
    %33 = vector.multi_reduction <add>, %32, %cst_21 [1] : vector<8x16xf32> to vector<8xf32>
    %34 = vector.shape_cast %33 : vector<8xf32> to vector<8x1xf32>
    %35 = tpu.reciprocal %34 {approx = true} : vector<8x1xf32> -> vector<8x1xf32>
    %36 = vector.broadcast %35 : vector<8x1xf32> to vector<8x16xf32>
    %37 = arith.mulf %32, %36 : vector<8x16xf32>
    %38 = arith.truncf %37 : vector<8x16xf32> to vector<8x16xbf16>
    %cst_22 = arith.constant dense<0.000000e+00> : vector<8x8xf32>
    %39 = tpu.matmul %38, %26, %cst_22 {dimension_numbers = #tpu.dot_dimension_numbers<[1], [0], [0], [1], [0, 0, 1, 1], [], []>} : vector<8x16xbf16>, vector<16x8xbf16>, vector<8x8xf32> -> vector<8x8xf32>
    %40 = vector.extract_strided_slice %11 {offsets = [0, 8], sizes = [8, 8], strides = [1, 1]} : vector<8x32xbf16> to vector<8x8xbf16>
    %41 = vector.extract_strided_slice %17 {offsets = [0, 8], sizes = [16, 8], strides = [1, 1]} : vector<16x32xbf16> to vector<16x8xbf16>
    %42 = vector.extract_strided_slice %23 {offsets = [0, 8], sizes = [16, 8], strides = [1, 1]} : vector<16x32xbf16> to vector<16x8xbf16>
    %cst_23 = arith.constant dense<0.000000e+00> : vector<8x16xf32>
    %43 = tpu.matmul %40, %41, %cst_23 {dimension_numbers = #tpu.dot_dimension_numbers<[1], [1], [0], [0], [0, 0, 1, 0], [], []>} : vector<8x8xbf16>, vector<16x8xbf16>, vector<8x16xf32> -> vector<8x16xf32>
    %cst_24 = arith.constant dense<0xFF800000> : vector<8xf32>
    %44 = vector.multi_reduction <maximumf>, %43, %cst_24 [1] : vector<8x16xf32> to vector<8xf32>
    %45 = vector.shape_cast %44 : vector<8xf32> to vector<8x1xf32>
    %46 = vector.broadcast %45 : vector<8x1xf32> to vector<8x16xf32>
    %47 = arith.subf %43, %46 : vector<8x16xf32>
    %48 = math.exp %47 : vector<8x16xf32>
    %cst_25 = arith.constant dense<0.000000e+00> : vector<8xf32>
    %49 = vector.multi_reduction <add>, %48, %cst_25 [1] : vector<8x16xf32> to vector<8xf32>
    %50 = vector.shape_cast %49 : vector<8xf32> to vector<8x1xf32>
    %51 = tpu.reciprocal %50 {approx = true} : vector<8x1xf32> -> vector<8x1xf32>
    %52 = vector.broadcast %51 : vector<8x1xf32> to vector<8x16xf32>
    %53 = arith.mulf %48, %52 : vector<8x16xf32>
    %54 = arith.truncf %53 : vector<8x16xf32> to vector<8x16xbf16>
    %cst_26 = arith.constant dense<0.000000e+00> : vector<8x8xf32>
    %55 = tpu.matmul %54, %42, %cst_26 {dimension_numbers = #tpu.dot_dimension_numbers<[1], [0], [0], [1], [0, 0, 1, 1], [], []>} : vector<8x16xbf16>, vector<16x8xbf16>, vector<8x8xf32> -> vector<8x8xf32>
    %56 = vector.extract_strided_slice %11 {offsets = [0, 16], sizes = [8, 8], strides = [1, 1]} : vector<8x32xbf16> to vector<8x8xbf16>
    %57 = vector.extract_strided_slice %17 {offsets = [0, 16], sizes = [16, 8], strides = [1, 1]} : vector<16x32xbf16> to vector<16x8xbf16>
    %58 = vector.extract_strided_slice %23 {offsets = [0, 16], sizes = [16, 8], strides = [1, 1]} : vector<16x32xbf16> to vector<16x8xbf16>
    %cst_27 = arith.constant dense<0.000000e+00> : vector<8x16xf32>
    %59 = tpu.matmul %56, %57, %cst_27 {dimension_numbers = #tpu.dot_dimension_numbers<[1], [1], [0], [0], [0, 0, 1, 0], [], []>} : vector<8x8xbf16>, vector<16x8xbf16>, vector<8x16xf32> -> vector<8x16xf32>
    %cst_28 = arith.constant dense<0xFF800000> : vector<8xf32>
    %60 = vector.multi_reduction <maximumf>, %59, %cst_28 [1] : vector<8x16xf32> to vector<8xf32>
    %61 = vector.shape_cast %60 : vector<8xf32> to vector<8x1xf32>
    %62 = vector.broadcast %61 : vector<8x1xf32> to vector<8x16xf32>
    %63 = arith.subf %59, %62 : vector<8x16xf32>
    %64 = math.exp %63 : vector<8x16xf32>
    %cst_29 = arith.constant dense<0.000000e+00> : vector<8xf32>
    %65 = vector.multi_reduction <add>, %64, %cst_29 [1] : vector<8x16xf32> to vector<8xf32>
    %66 = vector.shape_cast %65 : vector<8xf32> to vector<8x1xf32>
    %67 = tpu.reciprocal %66 {approx = true} : vector<8x1xf32> -> vector<8x1xf32>
    %68 = vector.broadcast %67 : vector<8x1xf32> to vector<8x16xf32>
    %69 = arith.mulf %64, %68 : vector<8x16xf32>
    %70 = arith.truncf %69 : vector<8x16xf32> to vector<8x16xbf16>
    %cst_30 = arith.constant dense<0.000000e+00> : vector<8x8xf32>
    %71 = tpu.matmul %70, %58, %cst_30 {dimension_numbers = #tpu.dot_dimension_numbers<[1], [0], [0], [1], [0, 0, 1, 1], [], []>} : vector<8x16xbf16>, vector<16x8xbf16>, vector<8x8xf32> -> vector<8x8xf32>
    %72 = vector.extract_strided_slice %11 {offsets = [0, 24], sizes = [8, 8], strides = [1, 1]} : vector<8x32xbf16> to vector<8x8xbf16>
    %73 = vector.extract_strided_slice %17 {offsets = [0, 24], sizes = [16, 8], strides = [1, 1]} : vector<16x32xbf16> to vector<16x8xbf16>
    %74 = vector.extract_strided_slice %23 {offsets = [0, 24], sizes = [16, 8], strides = [1, 1]} : vector<16x32xbf16> to vector<16x8xbf16>
    %cst_31 = arith.constant dense<0.000000e+00> : vector<8x16xf32>
    %75 = tpu.matmul %72, %73, %cst_31 {dimension_numbers = #tpu.dot_dimension_numbers<[1], [1], [0], [0], [0, 0, 1, 0], [], []>} : vector<8x8xbf16>, vector<16x8xbf16>, vector<8x16xf32> -> vector<8x16xf32>
    %cst_32 = arith.constant dense<0xFF800000> : vector<8xf32>
    %76 = vector.multi_reduction <maximumf>, %75, %cst_32 [1] : vector<8x16xf32> to vector<8xf32>
    %77 = vector.shape_cast %76 : vector<8xf32> to vector<8x1xf32>
    %78 = vector.broadcast %77 : vector<8x1xf32> to vector<8x16xf32>
    %79 = arith.subf %75, %78 : vector<8x16xf32>
    %80 = math.exp %79 : vector<8x16xf32>
    %cst_33 = arith.constant dense<0.000000e+00> : vector<8xf32>
    %81 = vector.multi_reduction <add>, %80, %cst_33 [1] : vector<8x16xf32> to vector<8xf32>
    %82 = vector.shape_cast %81 : vector<8xf32> to vector<8x1xf32>
    %83 = tpu.reciprocal %82 {approx = true} : vector<8x1xf32> -> vector<8x1xf32>
    %84 = vector.broadcast %83 : vector<8x1xf32> to vector<8x16xf32>
    %85 = arith.mulf %80, %84 : vector<8x16xf32>
    %86 = arith.truncf %85 : vector<8x16xf32> to vector<8x16xbf16>
    %cst_34 = arith.constant dense<0.000000e+00> : vector<8x8xf32>
    %87 = tpu.matmul %86, %74, %cst_34 {dimension_numbers = #tpu.dot_dimension_numbers<[1], [0], [0], [1], [0, 0, 1, 1], [], []>} : vector<8x16xbf16>, vector<16x8xbf16>, vector<8x8xf32> -> vector<8x8xf32>
    %88 = tpu.concatenate %39, %55, %71, %87 in 1 : vector<8x8xf32>, vector<8x8xf32>, vector<8x8xf32>, vector<8x8xf32> -> vector<8x32xf32>
    %89 = arith.truncf %88 : vector<8x32xf32> to vector<8x32xbf16>
    %c0_35 = arith.constant 0 : index
    %c0_36 = arith.constant 0 : index
    %90 = vector.load %arg10[%c0_35, %c0_36] : memref<32x32xbf16, #tpu.memory_space<vmem>>, vector<32x32xbf16>
    %cst_37 = arith.constant dense<0.000000e+00> : vector<8x32xf32>
    %91 = tpu.matmul %89, %90, %cst_37 {dimension_numbers = #tpu.dot_dimension_numbers<[1], [0], [0], [1], [0, 0, 1, 1], [], []>} : vector<8x32xbf16>, vector<32x32xbf16>, vector<8x32xf32> -> vector<8x32xf32>
    %c0_38 = arith.constant 0 : index
    %c0_39 = arith.constant 0 : index
    %92 = vector.load %arg11[%c0_38, %c0_39] : memref<1x32xf32, #tpu.memory_space<vmem>>, vector<1x32xf32>
    %93 = vector.broadcast %92 : vector<1x32xf32> to vector<8x32xf32>
    %94 = arith.addf %91, %93 : vector<8x32xf32>
    %95 = arith.addf %94, %1 : vector<8x32xf32>
    %c0_40 = arith.constant 0 : index
    %c0_41 = arith.constant 0 : index
    %96 = vector.load %arg12[%c0_40, %c0_41] : memref<1x32xf32, #tpu.memory_space<vmem>>, vector<1x32xf32>
    %c0_42 = arith.constant 0 : index
    %c0_43 = arith.constant 0 : index
    %97 = vector.load %arg13[%c0_42, %c0_43] : memref<1x32xf32, #tpu.memory_space<vmem>>, vector<1x32xf32>
    %cst_44 = arith.constant dense<0.000000e+00> : vector<8xf32>
    %98 = vector.multi_reduction <add>, %95, %cst_44 [1] : vector<8x32xf32> to vector<8xf32>
    %99 = vector.shape_cast %98 : vector<8xf32> to vector<8x1xf32>
    %cst_45 = arith.constant 3.200000e+01 : f32
    %100 = vector.broadcast %cst_45 : f32 to vector<8x1xf32>
    %101 = arith.divf %99, %100 : vector<8x1xf32>
    %102 = vector.broadcast %101 : vector<8x1xf32> to vector<8x32xf32>
    %103 = arith.subf %95, %102 : vector<8x32xf32>
    %104 = arith.mulf %103, %103 : vector<8x32xf32>
    %cst_46 = arith.constant dense<0.000000e+00> : vector<8xf32>
    %105 = vector.multi_reduction <add>, %104, %cst_46 [1] : vector<8x32xf32> to vector<8xf32>
    %106 = vector.shape_cast %105 : vector<8xf32> to vector<8x1xf32>
    %cst_47 = arith.constant 3.200000e+01 : f32
    %107 = vector.broadcast %cst_47 : f32 to vector<8x1xf32>
    %108 = arith.divf %106, %107 : vector<8x1xf32>
    %109 = vector.broadcast %101 : vector<8x1xf32> to vector<8x32xf32>
    %110 = arith.subf %95, %109 : vector<8x32xf32>
    %cst_48 = arith.constant 1.000000e-07 : f32
    %111 = vector.broadcast %cst_48 : f32 to vector<8x1xf32>
    %112 = arith.addf %108, %111 : vector<8x1xf32>
    %113 = math.rsqrt %112 : vector<8x1xf32>
    %114 = vector.broadcast %113 : vector<8x1xf32> to vector<8x32xf32>
    %115 = arith.mulf %110, %114 : vector<8x32xf32>
    %116 = vector.broadcast %96 : vector<1x32xf32> to vector<8x32xf32>
    %117 = arith.mulf %116, %115 : vector<8x32xf32>
    %118 = vector.broadcast %97 : vector<1x32xf32> to vector<8x32xf32>
    %119 = arith.addf %117, %118 : vector<8x32xf32>
    %120 = arith.truncf %119 : vector<8x32xf32> to vector<8x32xbf16>
    %c0_49 = arith.constant 0 : index
    %c0_50 = arith.constant 0 : index
    %121 = vector.load %arg14[%c0_49, %c0_50] : memref<32x64xbf16, #tpu.memory_space<vmem>>, vector<32x64xbf16>
    %cst_51 = arith.constant dense<0.000000e+00> : vector<8x64xf32>
    %122 = tpu.matmul %120, %121, %cst_51 {dimension_numbers = #tpu.dot_dimension_numbers<[1], [0], [0], [1], [0, 0, 1, 1], [], []>} : vector<8x32xbf16>, vector<32x64xbf16>, vector<8x64xf32> -> vector<8x64xf32>
    %c0_52 = arith.constant 0 : index
    %c0_53 = arith.constant 0 : index
    %123 = vector.load %arg15[%c0_52, %c0_53] : memref<1x64xf32, #tpu.memory_space<vmem>>, vector<1x64xf32>
    %124 = vector.broadcast %123 : vector<1x64xf32> to vector<8x64xf32>
    %125 = arith.addf %122, %124 : vector<8x64xf32>
    %cst_54 = arith.constant 5.000000e-01 : f32
    %126 = vector.broadcast %cst_54 : f32 to vector<8x64xf32>
    %127 = arith.mulf %126, %125 : vector<8x64xf32>
    %cst_55 = arith.constant 0.707106769 : f32
    %128 = vector.broadcast %cst_55 : f32 to vector<8x64xf32>
    %129 = arith.mulf %125, %128 : vector<8x64xf32>
    %130 = math.absf %129 : vector<8x64xf32>
    %cst_56 = arith.constant 0.327591091 : f32
    %131 = vector.broadcast %cst_56 : f32 to vector<8x64xf32>
    %132 = arith.mulf %131, %130 : vector<8x64xf32>
    %cst_57 = arith.constant 1.000000e+00 : f32
    %133 = vector.broadcast %cst_57 : f32 to vector<8x64xf32>
    %134 = arith.addf %133, %132 : vector<8x64xf32>
    %135 = tpu.reciprocal %134 {approx = true} : vector<8x64xf32> -> vector<8x64xf32>
    %cst_58 = arith.constant 1.06140542 : f32
    %136 = vector.broadcast %cst_58 : f32 to vector<8x64xf32>
    %137 = arith.mulf %136, %135 : vector<8x64xf32>
    %cst_59 = arith.constant -1.45315206 : f32
    %138 = vector.broadcast %cst_59 : f32 to vector<8x64xf32>
    %139 = arith.addf %137, %138 : vector<8x64xf32>
    %140 = arith.mulf %139, %135 : vector<8x64xf32>
    %cst_60 = arith.constant 1.42141378 : f32
    %141 = vector.broadcast %cst_60 : f32 to vector<8x64xf32>
    %142 = arith.addf %140, %141 : vector<8x64xf32>
    %143 = arith.mulf %142, %135 : vector<8x64xf32>
    %cst_61 = arith.constant -0.284496725 : f32
    %144 = vector.broadcast %cst_61 : f32 to vector<8x64xf32>
    %145 = arith.addf %143, %144 : vector<8x64xf32>
    %146 = arith.mulf %145, %135 : vector<8x64xf32>
    %cst_62 = arith.constant 0.254829586 : f32
    %147 = vector.broadcast %cst_62 : f32 to vector<8x64xf32>
    %148 = arith.addf %146, %147 : vector<8x64xf32>
    %149 = arith.mulf %148, %135 : vector<8x64xf32>
    %cst_63 = arith.constant 0.000000e+00 : f32
    %150 = vector.broadcast %cst_63 : f32 to vector<8x64xf32>
    %151 = arith.subf %150, %130 : vector<8x64xf32>
    %152 = arith.mulf %151, %130 : vector<8x64xf32>
    %153 = math.exp %152 : vector<8x64xf32>
    %154 = arith.mulf %149, %153 : vector<8x64xf32>
    %cst_64 = arith.constant 1.000000e+00 : f32
    %155 = vector.broadcast %cst_64 : f32 to vector<8x64xf32>
    %156 = arith.subf %155, %154 : vector<8x64xf32>
    %cst_65 = arith.constant 0.000000e+00 : f32
    %157 = vector.broadcast %cst_65 : f32 to vector<8x64xf32>
    %158 = arith.cmpf oge, %129, %157 : vector<8x64xf32>
    %cst_66 = arith.constant 0.000000e+00 : f32
    %159 = vector.broadcast %cst_66 : f32 to vector<8x64xf32>
    %160 = arith.subf %159, %156 : vector<8x64xf32>
    %161 = arith.select %158, %156, %160 : vector<8x64xi1>, vector<8x64xf32>
    %cst_67 = arith.constant 1.000000e+00 : f32
    %162 = vector.broadcast %cst_67 : f32 to vector<8x64xf32>
    %163 = arith.addf %162, %161 : vector<8x64xf32>
    %164 = arith.mulf %127, %163 : vector<8x64xf32>
    %165 = arith.truncf %164 : vector<8x64xf32> to vector<8x64xbf16>
    %c0_68 = arith.constant 0 : index
    %c0_69 = arith.constant 0 : index
    %166 = vector.load %arg16[%c0_68, %c0_69] : memref<64x32xbf16, #tpu.memory_space<vmem>>, vector<64x32xbf16>
    %cst_70 = arith.constant dense<0.000000e+00> : vector<8x32xf32>
    %167 = tpu.matmul %165, %166, %cst_70 {dimension_numbers = #tpu.dot_dimension_numbers<[1], [0], [0], [1], [0, 0, 1, 1], [], []>} : vector<8x64xbf16>, vector<64x32xbf16>, vector<8x32xf32> -> vector<8x32xf32>
    %c0_71 = arith.constant 0 : index
    %c0_72 = arith.constant 0 : index
    %168 = vector.load %arg17[%c0_71, %c0_72] : memref<1x32xf32, #tpu.memory_space<vmem>>, vector<1x32xf32>
    %169 = vector.broadcast %168 : vector<1x32xf32> to vector<8x32xf32>
    %170 = arith.addf %167, %169 : vector<8x32xf32>
    %171 = arith.addf %170, %119 : vector<8x32xf32>
    %c0_73 = arith.constant 0 : index
    %c0_74 = arith.constant 0 : index
    %172 = vector.load %arg18[%c0_73, %c0_74] : memref<1x32xf32, #tpu.memory_space<vmem>>, vector<1x32xf32>
    %c0_75 = arith.constant 0 : index
    %c0_76 = arith.constant 0 : index
    %173 = vector.load %arg19[%c0_75, %c0_76] : memref<1x32xf32, #tpu.memory_space<vmem>>, vector<1x32xf32>
    %cst_77 = arith.constant dense<0.000000e+00> : vector<8xf32>
    %174 = vector.multi_reduction <add>, %171, %cst_77 [1] : vector<8x32xf32> to vector<8xf32>
    %175 = vector.shape_cast %174 : vector<8xf32> to vector<8x1xf32>
    %cst_78 = arith.constant 3.200000e+01 : f32
    %176 = vector.broadcast %cst_78 : f32 to vector<8x1xf32>
    %177 = arith.divf %175, %176 : vector<8x1xf32>
    %178 = vector.broadcast %177 : vector<8x1xf32> to vector<8x32xf32>
    %179 = arith.subf %171, %178 : vector<8x32xf32>
    %180 = arith.mulf %179, %179 : vector<8x32xf32>
    %cst_79 = arith.constant dense<0.000000e+00> : vector<8xf32>
    %181 = vector.multi_reduction <add>, %180, %cst_79 [1] : vector<8x32xf32> to vector<8xf32>
    %182 = vector.shape_cast %181 : vector<8xf32> to vector<8x1xf32>
    %cst_80 = arith.constant 3.200000e+01 : f32
    %183 = vector.broadcast %cst_80 : f32 to vector<8x1xf32>
    %184 = arith.divf %182, %183 : vector<8x1xf32>
    %185 = vector.broadcast %177 : vector<8x1xf32> to vector<8x32xf32>
    %186 = arith.subf %171, %185 : vector<8x32xf32>
    %cst_81 = arith.constant 1.000000e-07 : f32
    %187 = vector.broadcast %cst_81 : f32 to vector<8x1xf32>
    %188 = arith.addf %184, %187 : vector<8x1xf32>
    %189 = math.rsqrt %188 : vector<8x1xf32>
    %190 = vector.broadcast %189 : vector<8x1xf32> to vector<8x32xf32>
    %191 = arith.mulf %186, %190 : vector<8x32xf32>
    %192 = vector.broadcast %172 : vector<1x32xf32> to vector<8x32xf32>
    %193 = arith.mulf %192, %191 : vector<8x32xf32>
    %194 = vector.broadcast %173 : vector<1x32xf32> to vector<8x32xf32>
    %195 = arith.addf %193, %194 : vector<8x32xf32>
    %c0_82 = arith.constant 0 : index
    %c0_83 = arith.constant 0 : index
    %c0_84 = arith.constant 0 : index
    %196 = vector.load %arg20[%c0_82, %c0_83, %c0_84] : memref<1x8x32xf32, #tpu.memory_space<vmem>>, vector<1x8x32xf32>
    %197 = vector.shape_cast %196 : vector<1x8x32xf32> to vector<8x32xf32>
    %198 = vector.shape_cast %195 : vector<8x32xf32> to vector<1x8x32xf32>
    tpu.vector_store %arg20[%c0_82, %c0_83, %c0_84], %198 {strides = array<i32>} : memref<1x8x32xf32, #tpu.memory_space<vmem>>, vector<1x8x32xf32>,
    return
  }
  func.func @transform_0(%arg0: i32, %arg1: i32) -> (i32, i32, i32) {
    %c0_i32 = arith.constant 0 : i32
    %c0_i32_0 = arith.constant 0 : i32
    return %arg0, %arg1, %c0_i32 : i32, i32, i32
  }
  func.func @transform_1(%arg0: i32, %arg1: i32) -> (i32, i32, i32) {
    %c0_i32 = arith.constant 0 : i32
    %c0_i32_0 = arith.constant 0 : i32
    %c0_i32_1 = arith.constant 0 : i32
    return %arg0, %c0_i32, %c0_i32_0 : i32, i32, i32
  }
  func.func @transform_2(%arg0: i32, %arg1: i32) -> (i32, i32) {
    %c0_i32 = arith.constant 0 : i32
    %c0_i32_0 = arith.constant 0 : i32
    %c0_i32_1 = arith.constant 0 : i32
    return %c0_i32, %c0_i32_0 : i32, i32
  }
  func.func @transform_3(%arg0: i32, %arg1: i32) -> (i32, i32) {
    %c0_i32 = arith.constant 0 : i32
    %c0_i32_0 = arith.constant 0 : i32
    %c0_i32_1 = arith.constant 0 : i32
    return %c0_i32, %c0_i32_0 : i32, i32
  }
  func.func @transform_4(%arg0: i32, %arg1: i32) -> (i32, i32) {
    %c0_i32 = arith.constant 0 : i32
    %c0_i32_0 = arith.constant 0 : i32
    %c0_i32_1 = arith.constant 0 : i32
    return %c0_i32, %c0_i32_0 : i32, i32
  }
  func.func @transform_5(%arg0: i32, %arg1: i32) -> (i32, i32) {
    %c0_i32 = arith.constant 0 : i32
    %c0_i32_0 = arith.constant 0 : i32
    %c0_i32_1 = arith.constant 0 : i32
    return %c0_i32, %c0_i32_0 : i32, i32
  }
  func.func @transform_6(%arg0: i32, %arg1: i32) -> (i32, i32) {
    %c0_i32 = arith.constant 0 : i32
    %c0_i32_0 = arith.constant 0 : i32
    %c0_i32_1 = arith.constant 0 : i32
    return %c0_i32, %c0_i32_0 : i32, i32
  }
  func.func @transform_7(%arg0: i32, %arg1: i32) -> (i32, i32) {
    %c0_i32 = arith.constant 0 : i32
    %c0_i32_0 = arith.constant 0 : i32
    %c0_i32_1 = arith.constant 0 : i32
    return %c0_i32, %c0_i32_0 : i32, i32
  }
  func.func @transform_8(%arg0: i32, %arg1: i32) -> (i32, i32) {
    %c0_i32 = arith.constant 0 : i32
    %c0_i32_0 = arith.constant 0 : i32
    %c0_i32_1 = arith.constant 0 : i32
    return %c0_i32, %c0_i32_0 : i32, i32
  }
  func.func @transform_9(%arg0: i32, %arg1: i32) -> (i32, i32) {
    %c0_i32 = arith.constant 0 : i32
    %c0_i32_0 = arith.constant 0 : i32
    %c0_i32_1 = arith.constant 0 : i32
    return %c0_i32, %c0_i32_0 : i32, i32
  }
  func.func @transform_10(%arg0: i32, %arg1: i32) -> (i32, i32) {
    %c0_i32 = arith.constant 0 : i32
    %c0_i32_0 = arith.constant 0 : i32
    %c0_i32_1 = arith.constant 0 : i32
    return %c0_i32, %c0_i32_0 : i32, i32
  }
  func.func @transform_11(%arg0: i32, %arg1: i32) -> (i32, i32) {
    %c0_i32 = arith.constant 0 : i32
    %c0_i32_0 = arith.constant 0 : i32
    %c0_i32_1 = arith.constant 0 : i32
    return %c0_i32, %c0_i32_0 : i32, i32
  }
  func.func @transform_12(%arg0: i32, %arg1: i32) -> (i32, i32) {
    %c0_i32 = arith.constant 0 : i32
    %c0_i32_0 = arith.constant 0 : i32
    %c0_i32_1 = arith.constant 0 : i32
    return %c0_i32, %c0_i32_0 : i32, i32
  }
  func.func @transform_13(%arg0: i32, %arg1: i32) -> (i32, i32) {
    %c0_i32 = arith.constant 0 : i32
    %c0_i32_0 = arith.constant 0 : i32
    %c0_i32_1 = arith.constant 0 : i32
    return %c0_i32, %c0_i32_0 : i32, i32
  }
  func.func @transform_14(%arg0: i32, %arg1: i32) -> (i32, i32) {
    %c0_i32 = arith.constant 0 : i32
    %c0_i32_0 = arith.constant 0 : i32
    %c0_i32_1 = arith.constant 0 : i32
    return %c0_i32, %c0_i32_0 : i32, i32
  }
  func.func @transform_15(%arg0: i32, %arg1: i32) -> (i32, i32) {
    %c0_i32 = arith.constant 0 : i32
    %c0_i32_0 = arith.constant 0 : i32
    %c0_i32_1 = arith.constant 0 : i32
    return %c0_i32, %c0_i32_0 : i32, i32
  }
  func.func @transform_16(%arg0: i32, %arg1: i32) -> (i32, i32) {
    %c0_i32 = arith.constant 0 : i32
    %c0_i32_0 = arith.constant 0 : i32
    %c0_i32_1 = arith.constant 0 : i32
    return %c0_i32, %c0_i32_0 : i32, i32
  }
  func.func @transform_17(%arg0: i32, %arg1: i32) -> (i32, i32) {
    %c0_i32 = arith.constant 0 : i32
    %c0_i32_0 = arith.constant 0 : i32
    %c0_i32_1 = arith.constant 0 : i32
    return %c0_i32, %c0_i32_0 : i32, i32
  }
  func.func @transform_18(%arg0: i32, %arg1: i32) -> (i32, i32, i32) {
    %c0_i32 = arith.constant 0 : i32
    %c0_i32_0 = arith.constant 0 : i32
    return %arg0, %arg1, %c0_i32 : i32, i32, i32
  }
}

</mosaic_0001>

<bundles_post_ra>
// kernel: tpu_custom_call.1
= control target key start
LH: loop header
LB: loop body
LE: loop exit
PB: predicated region body
PF: predicated region fallthrough
CT: control target
= control target key end

     0   :  { %s2978_s0 = inlined_call_operand.vmem [shape: f32[2,8,32], index: 0, kind: input, shape index: {}]   ;;  %s2979_s1 = inlined_call_operand.vmem [shape: f32[2,16,32], index: 1, kind: input, shape index: {}]   ;;  %s2980_s2 = inlined_call_operand.hbm [shape: bf16[32,32], index: 2, kind: input, shape index: {}]   ;;  %s2981_s3 = inlined_call_operand.vmem [shape: f32[1,32], index: 3, kind: input, shape index: {}]   ;;  %s2982_s4 = inlined_call_operand.hbm [shape: bf16[32,32], index: 4, kind: input, shape index: {}]   ;;  %s2983_s5 = inlined_call_operand.vmem [shape: f32[1,32], index: 5, kind: input, shape index: {}]   ;;  %s2984_s6 = inlined_call_operand.hbm [shape: bf16[32,32], index: 6, kind: input, shape index: {}]   ;;  %s2985_s7 = inlined_call_operand.hbm [shape: f32[1,32], index: 7, kind: input, shape index: {}]   ;;  %s2986_s8 = inlined_call_operand.hbm [shape: bf16[32,32], index: 8, kind: input, shape index: {}]   ;;  %s2987_s9 = inlined_call_operand.hbm [shape: f32[1,32], index: 9, kind: input, shape index: {}]   ;;  %s2988_s10 = inlined_call_operand.vmem [shape: f32[1,32], index: 10, kind: input, shape index: {}]   ;;  %s2989_s11 = inlined_call_operand.vmem [shape: f32[1,32], index: 11, kind: input, shape index: {}]   ;;  %s2990_s12 = inlined_call_operand.vmem [shape: bf16[32,64], index: 12, kind: input, shape index: {}]   ;;  %s2991_s13 = inlined_call_operand.vmem [shape: f32[1,64], index: 13, kind: input, shape index: {}]   ;;  %s2992_s14 = inlined_call_operand.vmem [shape: bf16[64,32], index: 14, kind: input, shape index: {}]   ;;  %s2993_s15 = inlined_call_operand.vmem [shape: f32[1,32], index: 15, kind: input, shape index: {}]   ;;  %s2994_s16 = inlined_call_operand.vmem [shape: f32[1,32], index: 16, kind: input, shape index: {}]   ;;  %s2995_s17 = inlined_call_operand.vmem [shape: f32[1,32], index: 17, kind: input, shape index: {}]   ;;  %s2996_s18 = inlined_call_operand.hbm [shape: f32[2,8,32], index: 18, kind: output, shape index: {}]  }
   0x1   :  { %3017 = sst [smem:[#allocation28_spill]] %s2978_s0 }
   0x2   :  { %3018 = sst [smem:[#allocation29_spill]] %s2979_s1 }
   0x3   :  { %3019 = sst [smem:[#allocation30_spill]] %s2980_s2 }
   0x4   :  { %3020 = sst [smem:[#allocation31_spill]] %s2982_s4 }
   0x5   :  { %3021 = sst [smem:[#allocation32_spill]] %s2985_s7 }
   0x6   :  { %3022 = sst [smem:[#allocation33_spill]] %s2993_s15 }
   0x7   :  { %3023 = sst [smem:[#allocation34_spill]] %s2994_s16 }
   0x8   :  { %3024 = sst [smem:[#allocation35_spill]] %s2995_s17 }
   0x9   :  { %3025 = sst [smem:[#allocation36_spill]] %s2996_s18 }
   0xa   :  { %23 = vsyncpa [#allocation3], 0 }
   0xb   :  { %24 = vsyncpa [#allocation6], 0 }
   0xc   :  { %25 = vsyncpa [#allocation9], 0 }
   0xd   :  { %26 = vsyncpa [#allocation12], 0 }
   0xe   :  { %27 = vsyncpa [#allocation4], 0 }
   0xf   :  { %29 = vsyncpa [#allocation4 + $0x1], 0  ;;  %s2557_s27 = smov 0   ;;  %s2559_s28 = smov 0  }
  0x10   :  { %s2561_s29 = smov 0   ;;  %s2563_s30 = smov 0  }
  0x11   :  { %s2565_s0 = smov 0   ;;  %s2567_s19 = smov 0  }
  0x12 LB: > { %3026 = sst [smem:[#allocation19_spill]] %s2423_s27  ;;  %s1817_s1 = sadd.s32 4294967295, %s2443_s19   ;;  %s2443_s19 = sphi %s2567_s19, %s35_s19   ;;  %s2439_s0 = sphi %s2565_s0, %s3066_s0   ;;  %s2435_s30 = sphi %s2563_s30, %s3065_s30   ;;  %s2431_s29 = sphi %s2561_s29, %s3064_s29   ;;  %s2427_s28 = sphi %s2559_s28, %s3063_s28   ;;  %s2423_s27 = sphi %s2557_s27, %s3062_s27  }
  0x13   : > { %3027 = sst [smem:[#allocation20_spill]] %s2427_s28  ;;  %s1818_s20 = sadd.s32 4294967294, %s2443_s19  }
  0x14   : > { %3028 = sst [smem:[#allocation21_spill]] %s2431_s29  ;;  %s47_s21 = sadd.s32 1, %s2439_s0 }
  0x15   : > { %3029 = sst [smem:[#allocation22_spill]] %s2439_s0  ;;  %s446_s22 = sadd.s32 1, %s2431_s29 }
  0x16   : > { %3030 = sst [smem:[#allocation23_spill]] %s2443_s19  ;;  %p49_p0 = scmp.ge.s32.totalorder %s47_s21, 2 }
  0x17   : > { %p456_p1 = scmp.ne.s32.totalorder %s2431_s29, %s2427_s28  ;;  %p457_p2 = scmp.eq.s32.totalorder %s1817_s1, 1 }
  0x18   : > { %p462_p3 = scmp.ne.s32.totalorder %s2427_s28, %s2423_s27  ;;  %s3068_s21 = smov (%p49_p0, %s47_s21), 0 }
  0x19   : > { %3031 = sst [smem:[#allocation24_spill]] %s3068_s21  ;;  %p2597_p4 = por %p457_p2, %p456_p1 }
  0x1a   : > { %p463_p5 = scmp.eq.s32.totalorder %s1818_s20, 1  ;;  %s441_s23 = ssub.s32 %s2439_s0, %s3068_s21 }
  0x1b   : > { %s3032_s2 = scalar_select %p2597_p4, 1, 0 }
  0x1c   : > { %p1819_p6 = scmp.ge.s32.totalorder %s2443_s19, 1  ;;  %p444_p7 = scmp.eq.s32.totalorder %s441_s23, 0 }
  0x1d   : > { %3033 = sst [smem:[#allocation25_spill]] %s3032_s2  ;;  %p2604_p8 = por %p463_p5, %p462_p3 }
  0x1e   : > { %p470_p9 = scmp.lt.s32.totalorder %s2443_s19, 3  ;;  %p2616_p11 = scmp.eq.s32.totalorder %s1817_s1, 0 }
  0x1f   : > { %s3034_s24 = scalar_select %p2604_p8, 1, 0 }
  0x20   : > { %s2610_s25 = scalar_select %p444_p7, %s2431_s29, %s446_s22  }
  0x21   : > { %3035 = sst [smem:[#allocation26_spill]] %s3034_s24  ;;  %p2612_p10 = pnand %p1819_p6, %p470_p9 }
  0x22   : > { %3036 = sst [smem:[#allocation27_spill]] %s2610_s25  ;;  %s2445_s20 = smov [#allocation5]  }
  0x23   : > { %s3037_s26 = scalar_select %p2612_p10, 1, 0 }
  0x24   : > { %s3038_s27 = scalar_select %p2616_p11, 1, 0 }
  0x25   : > { %p2043_p12 = pneg %p2612_p10  ;;  %s498_s23 = sshll.u32 %s2445_s20, 4  ;;  %s499_s23 = int_to_ptr.vmem [resolvable:$true] %s498_s23 }
  0x26   : > { %s2446_s22 = smov [#allocation8]   ;;  %s3040_s4 = sld [smem:[#allocation31_spill]] }
  0x27   : > { %p2624_p13 = pnand %p2616_p11, %p2043_p12  ;;  %s528_s0 = sshll.u32 %s2446_s22, 4  ;;  %s2628_s0 = int_to_ptr.vmem [resolvable:$true] %s528_s0 }
  0x29   : > { %p2638_p1 = pneg %p2624_p13 }
  0x2c   : > { %s2181_s29 = scalar_lea.hbm %s3040_s4, 256 }
  0x2d   : > { %p2182_p0 = scmp.ne.s32.totalorder %s3040_s4, %s2181_s29  ;;  %p2188_p5 = scmp.lt.u32.totalorder %s2181_s29, %s3040_s4 }
  0x2f   : > { %p2184_p2 = pnand %p2638_p1, %p2182_p0 }
  0x31   : > { %p2185_p3 = pneg %p2184_p2 }
  0x33   : > { %p2190_p6 = pnand %p2188_p5, %p2185_p3 }
  0x35   : > { %2193 = shalt.err (!%p2190_p6)
}
  0x36   : > { %s2194_s25 = scalar_lea.vmem %s499_s23, 256  ;;  %p2202_p8 = scmp.lt.s32.totalorder %s499_s23, %s499_s23 }
  0x37   : > { %p2195_p7 = scmp.ne.s32.totalorder %s499_s23, %s2194_s25  ;;  %p2203_p4 = scmp.lt.s32.totalorder %s2194_s25, %s2194_s25 }
  0x39   : > { %p2197_p9 = pnand %p2195_p7, %p2638_p1  ;;  %p2204_p11 = por %p2203_p4, %p2202_p8 }
  0x3b   : > { %p2198_p12 = pneg %p2197_p9 }
  0x3d   : > { %p2205_p10 = pnand %p2204_p11, %p2198_p12 }
  0x3f   : > { %2208 = shalt.err (!%p2205_p10)
}
  0x40   : > { %s3013_s19 = smov 64   ;;  %s3015_s24 = smov 4  }
  0x41   : > { %2049 = dma.hbm_to_vmem [thread:$0]  (!%p2624_p13), %s3040_s4, 256, %s499_s23, [#allocation6], %s3013_s19, %s3013_s19, %s3015_s24  }
  0x42   : > { %s3042_s7 = sld [smem:[#allocation32_spill]] }
  0x48   : > { %s2209_s17 = scalar_lea.hbm %s3042_s7, 16 }
  0x49   : > { %p2210_p4 = scmp.ne.s32.totalorder %s3042_s7, %s2209_s17  ;;  %p2216_p11 = scmp.lt.u32.totalorder %s2209_s17, %s3042_s7 }
  0x4b   : > { %p2212_p8 = pnand %p2210_p4, %p2638_p1 }
  0x4d   : > { %p2213_p10 = pneg %p2212_p8 }
  0x4f   : > { %p2218_p0 = pnand %p2216_p11, %p2213_p10 }
  0x51   : > { %2221 = shalt.err (!%p2218_p0)
}
  0x52   : > { %s2222_s23 = scalar_lea.vmem %s2628_s0, 16  ;;  %s2229_s16 = scalar_lea.vmem %s2628_s0, 32 }
  0x53   : > { %p2223_p2 = scmp.ne.s32.totalorder %s2628_s0, %s2222_s23  ;;  %p2230_p6 = scmp.lt.s32.totalorder %s2628_s0, %s2628_s0 }
  0x54   : > { %p2231_p7 = scmp.lt.s32.totalorder %s2229_s16, %s2222_s23 }
  0x55   : > { %p2225_p3 = pnand %p2223_p2, %p2638_p1 }
  0x56   : > { %p2232_p9 = por %p2231_p7, %p2230_p6 }
  0x57   : > { %p2226_p5 = pneg %p2225_p3 }
  0x59   : > { %p2233_p12 = pnand %p2232_p9, %p2226_p5 }
  0x5b   : > { %2236 = shalt.err (!%p2233_p12)
}
  0x5c   : > { %2055 = dma.hbm_to_vmem [thread:$0]  (!%p2624_p13), %s3042_s7, 16, %s2628_s0, [#allocation9]  }
  0x5d   : > { %s2449_s2 = smov [#allocation2]   ;;  %s2450_s29 = smov [#allocation7]  }
  0x5e   : > { %s482_s18 = sshll.u32 %s2449_s2, 4  ;;  %s514_s1 = sshll.u32 %s2450_s29, 4  ;;  %s483_s18 = int_to_ptr.vmem [resolvable:$true] %s482_s18  ;;  %s515_s1 = int_to_ptr.vmem [resolvable:$true] %s514_s1 }
  0x5f   : > { %s3043_s19 = sld [smem:[#allocation30_spill]] }
  0x65   : > { %s3044_s24 = smov %s3043_s19  ;;  %s2237_s23 = scalar_lea.hbm %s3043_s19, 256 }
  0x66   : > { %p2238_p4 = scmp.ne.s32.totalorder %s3044_s24, %s2237_s23  ;;  %p2244_p11 = scmp.lt.u32.totalorder %s2237_s23, %s3044_s24 }
  0x68   : > { %p2240_p8 = pnand %p2238_p4, %p2638_p1 }
  0x6a   : > { %p2241_p10 = pneg %p2240_p8 }
  0x6c   : > { %p2246_p0 = pnand %p2244_p11, %p2241_p10 }
  0x6e   : > { %2249 = shalt.err (!%p2246_p0)
}
  0x6f   : > { %s2250_s0 = scalar_lea.vmem %s483_s18, 256  ;;  %p2258_p6 = scmp.lt.s32.totalorder %s483_s18, %s483_s18 }
  0x70   : > { %p2251_p2 = scmp.ne.s32.totalorder %s483_s18, %s2250_s0  ;;  %p2259_p7 = scmp.lt.s32.totalorder %s2250_s0, %s2250_s0 }
  0x72   : > { %p2253_p3 = pnand %p2251_p2, %p2638_p1  ;;  %p2260_p9 = por %p2259_p7, %p2258_p6 }
  0x74   : > { %p2254_p5 = pneg %p2253_p3 }
  0x76   : > { %p2261_p12 = pnand %p2260_p9, %p2254_p5 }
  0x78   : > { %2264 = shalt.err (!%p2261_p12)
}
  0x79   : > { %s3045_s4 = smov 4   ;;  %s3046_s19 = smov 64  }
  0x7a   : > { %2046 = dma.hbm_to_vmem [thread:$0]  (!%p2624_p13), %s3044_s24, 256, %s483_s18, [#allocation3], %s3046_s19, %s3046_s19, %s3045_s4  }
  0x7b   : > { %s2265_s22 = scalar_lea.hbm %s2984_s6, 256 }
  0x7c   : > { %p2266_p4 = scmp.ne.s32.totalorder %s2984_s6, %s2265_s22  ;;  %p2272_p11 = scmp.lt.u32.totalorder %s2265_s22, %s2984_s6 }
  0x7e   : > { %p2268_p8 = pnand %p2266_p4, %p2638_p1 }
  0x80   : > { %p2269_p10 = pneg %p2268_p8 }
  0x82   : > { %p2274_p0 = pnand %p2272_p11, %p2269_p10 }
  0x84   : > { %2277 = shalt.err (!%p2274_p0)
}
  0x85   : > { %s2278_s0 = scalar_lea.vmem %s515_s1, 256  ;;  %p2286_p6 = scmp.lt.s32.totalorder %s515_s1, %s515_s1 }
  0x86   : > { %p2279_p2 = scmp.ne.s32.totalorder %s515_s1, %s2278_s0  ;;  %p2287_p7 = scmp.lt.s32.totalorder %s2278_s0, %s2278_s0 }
  0x88   : > { %p2281_p3 = pnand %p2279_p2, %p2638_p1  ;;  %p2288_p9 = por %p2287_p7, %p2286_p6 }
  0x8a   : > { %p2282_p5 = pneg %p2281_p3 }
  0x8c   : > { %p2289_p12 = pnand %p2288_p9, %p2282_p5 }
  0x8e   : > { %2292 = shalt.err (!%p2289_p12)
}
  0x8f   : > { %2052 = dma.hbm_to_vmem [thread:$0]  (!%p2624_p13), %s2984_s6, 256, %s515_s1, [#allocation6], %s3046_s19, %s3046_s19, %s3045_s4  }
  0x90   : > { %s2451_s28 = smov [#allocation10]   ;;  %s2452_s29 = smov [#allocation11]  }
  0x91   : > { %s538_s2 = sshll.u32 %s2451_s28, 4  ;;  %s552_s22 = sshll.u32 %s2452_s29, 4  ;;  %s539_s2 = int_to_ptr.vmem [resolvable:$true] %s538_s2  ;;  %s553_s22 = int_to_ptr.vmem [resolvable:$true] %s552_s22 }
  0x92   : > { %s2293_s16 = scalar_lea.hbm %s2986_s8, 256 }
  0x93   : > { %p2294_p4 = scmp.ne.s32.totalorder %s2986_s8, %s2293_s16  ;;  %p2300_p11 = scmp.lt.u32.totalorder %s2293_s16, %s2986_s8 }
  0x95   : > { %p2296_p8 = pnand %p2294_p4, %p2638_p1 }
  0x97   : > { %p2297_p10 = pneg %p2296_p8 }
  0x99   : > { %p2302_p0 = pnand %p2300_p11, %p2297_p10 }
  0x9b   : > { %2305 = shalt.err (!%p2302_p0)
}
  0x9c   : > { %s2306_s1 = scalar_lea.vmem %s539_s2, 256  ;;  %p2314_p6 = scmp.lt.s32.totalorder %s539_s2, %s539_s2 }
  0x9d   : > { %p2307_p2 = scmp.ne.s32.totalorder %s539_s2, %s2306_s1  ;;  %p2315_p7 = scmp.lt.s32.totalorder %s2306_s1, %s2306_s1 }
  0x9f   : > { %p2309_p3 = pnand %p2307_p2, %p2638_p1  ;;  %p2316_p9 = por %p2315_p7, %p2314_p6 }
  0xa1   : > { %p2310_p5 = pneg %p2309_p3 }
  0xa3   : > { %p2317_p12 = pnand %p2316_p9, %p2310_p5 }
  0xa5   : > { %2320 = shalt.err (!%p2317_p12)
}
  0xa6   : > { %2058 = dma.hbm_to_vmem [thread:$0]  (!%p2624_p13), %s2986_s8, 256, %s539_s2, [#allocation9], %s3046_s19, %s3046_s19, %s3045_s4  }
  0xa7   : > { %s2321_s25 = scalar_lea.hbm %s2987_s9, 16 }
  0xa8   : > { %p2322_p4 = scmp.ne.s32.totalorder %s2987_s9, %s2321_s25  ;;  %p2328_p11 = scmp.lt.u32.totalorder %s2321_s25, %s2987_s9 }
  0xaa   : > { %p2324_p8 = pnand %p2322_p4, %p2638_p1 }
  0xac   : > { %p2325_p10 = pneg %p2324_p8 }
  0xae   : > { %p2330_p0 = pnand %p2328_p11, %p2325_p10 }
  0xb0   : > { %2333 = shalt.err (!%p2330_p0)
}
  0xb1   : > { %s2334_s18 = scalar_lea.vmem %s553_s22, 16  ;;  %s2341_s4 = scalar_lea.vmem %s553_s22, 32 }
  0xb2   : > { %p2335_p2 = scmp.ne.s32.totalorder %s553_s22, %s2334_s18  ;;  %p2342_p6 = scmp.lt.s32.totalorder %s553_s22, %s553_s22 }
  0xb3   : > { %p2343_p7 = scmp.lt.s32.totalorder %s2341_s4, %s2334_s18 }
  0xb4   : > { %p2337_p3 = pnand %p2335_p2, %p2638_p1 }
  0xb5   : > { %p2344_p9 = por %p2343_p7, %p2342_p6 }
  0xb6   : > { %p2338_p5 = pneg %p2337_p3 }
  0xb8   : > { %p2345_p12 = pnand %p2344_p9, %p2338_p5 }
  0xba   : > { %2348 = shalt.err (!%p2345_p12)
}
  0xbb   : > { %2061 = dma.hbm_to_vmem [thread:$0]  (!%p2624_p13), %s2987_s9, 16, %s553_s22, [#allocation12]  }
  0xbc   : > { %p3047_p4 = scmp.ne.s32.totalorder %s3037_s26, 0 }
  0xbd   : > { %p3048_p8 = scmp.ne.s32.totalorder (!%p3047_p4), %s3038_s27, 0 }
  0xbe   : > { %607 = sbr.rel (%p3047_p4) target bundleno = 2768 (0xad0), region = 92 }
  0xc5   : > { %2402 = dma.done.wait (%p3048_p8), [#allocation3], 256  }
  0xc6   : > { %2404 = vsyncadd (%p3048_p8), [#allocation3], 4294967040 }
  0xc7   : > { %2406 = dma.done.wait (%p3048_p8), [#allocation6], 512  }
  0xc8   : > { %2408 = vsyncadd (%p3048_p8), [#allocation6], 4294966784 }
  0xc9   : > { %2410 = dma.done.wait (%p3048_p8), [#allocation9], 272  }
  0xca   : > { %2412 = vsyncadd (%p3048_p8), [#allocation9], 4294967024 }
  0xcb   : > { %2414 = dma.done.wait (%p3048_p8), [#allocation12], 16  }
  0xcc   : > { %2416 = vsyncadd (%p3048_p8), [#allocation12], 4294967280  ;;  %p688_p13 = scmp.lt.s32.totalorder %s2435_s30, 1  ;;  %v2453_v0 = vmov 0.0   ;;  %vm2454_vm0 = vmmov 0   ;;  %v2143_v1 = vld [vmem:[#allocation5] sm:$0xff]  }
  0xcd   : > { %1925 = vmatprep.subr.bf16.mxu1 %v2453_v0  ;;  %1917 = vmatprep.subr.bf16.mxu0 %v2453_v0  ;;  %s3049_s1 = sld [smem:[#allocation29_spill]]  ;;  %v2144_v2 = vld [vmem:[#allocation5 + $0x8] sm:$0xff]   ;;  %s3050_s29 = sld [smem:[#allocation28_spill]]  ;;  %v2145_v3 = vld [vmem:[#allocation2] sm:$0xff]   ;;  %v2146_v6 = vld [vmem:[#allocation2 + $0x8] sm:$0xff]   ;;  %vm729_vm1 = vcmask 261120  }
  0xce   : > { %1929 = vmatprep.mubr.msk.bf16.mxu1 %vm2454_vm0, %v2453_v0  ;;  %s689_s21 = scalar_select %p688_p13, %s2435_s30, 1  ;;  %1921 = vmatprep.mubr.msk.bf16.mxu0 %vm2454_vm0, %v2453_v0  ;;  %v1842_v10 = vld [vmem:[%s2983_s5] ss:$0 sm:$0xff]  ;;  %vm907_vm2 = vcmask 64512   ;;  %v2148_v27 = vld [vmem:[#allocation7 + $0x8] sm:$0xff]   ;;  %vm954_vm3 = vcmask 130048  }
  0xcf   : > { %1926 = vmatpush3.bf16.msra.mxu1 %v2143_v1  ;;  %1918 = vmatpush3.bf16.msra.mxu0 %v2145_v3  ;;  %v1838_v12 = vld [vmem:[%s2981_s3] ss:$0 sm:$0xff]  ;;  %s2455_s18 = smov 112   ;;  %s2456_s4 = smov 120   ;;  %v1846_v42 = vld [vmem:[#allocation8] ss:$0 sm:$0xff] }
  0xd0   : > { %s1880_s26 = sshll.u32 %s689_s21, 4  ;;  %s1835_s20 = sshll.u32 %s689_s21, 3  ;;  %1927 = vmatprep.subr.bf16.mxu1 %v2453_v0  ;;  %1919 = vmatprep.subr.bf16.mxu0 %v2453_v0  ;;  %v2147_v26 = vld [vmem:[#allocation7] sm:$0xff]   ;;  %vm1351_vm4 = vcmask 195584   ;;  %vm1584_vm6 = vcmask 523264  }
  0xd1   : > { %s2457_s19 = smov 104   ;;  %s2458_s2 = smov 8  }
  0xd2   : > { %s2459_s21 = smov 16   ;;  %s3051_s27 = sld [smem:[#allocation33_spill]] }
  0xd3   : > { %s699_s7 = scalar_lea.vmem %s3049_s1, %s1880_s26  ;;  %s694_s25 = scalar_lea.vmem %s3050_s29, %s1835_s20  ;;  %1928 = vmatpush3.bf16.msra.mxu1 %v2144_v2  ;;  %1920 = vmatpush3.bf16.msra.mxu0 %v2146_v6 }
  0xd4   : > { %v702_v4 = vld [vmem:[%s699_s7] sm:$0xff]  ;;  %v703_v5 = vld [vmem:[%s699_s7 + $0x8] sm:$0xff]  ;;  %1941 = vmatprep.subr.bf16.mxu1 %v2453_v0  ;;  %1933 = vmatprep.subr.bf16.mxu0 %v2453_v0  ;;  %s2460_s26 = smov 24   ;;  %s3052_s22 = sld [smem:[#allocation20_spill]] }
  0xd5   : > { %v2795_v7 = vld [vmem:[%s694_s25] sm:$0xff]  ;;  %v705_v8 = vpack.c.bf16 %v703_v5, %v702_v4  ;;  %s3053_s15 = sld [smem:[#allocation25_spill]]  ;;  %s3054_s25 = sld [smem:[#allocation34_spill]] }
  0xd6   : > { %v704_v9 = vpack.c.bf16 %v2795_v7, %v2795_v7  ;;  %s3055_s17 = sld [smem:[#allocation35_spill]]  ;;  %s1877_s0 = sshll.u32 %s2435_s30, 7 }
  0xd7   : > { %1930 = vmatmul.mubr.msk.bf16.vlgmr.msra.gmra.mrb[0].mxu1 %vm729_vm1, %v705_v8  ;;  %s2461_s30 = smov [#allocation13]  }
  0xd8   : > { %1943 = vmatprep.mubr.msk.bf16.mxu1 %vm2454_vm0, %v2453_v0  ;;  %1922 = vmatmul.mubr.msk.bf16.vlgmr.msra.gmra.mrb[0].mxu0 %vm729_vm1, %v704_v9 }
  0xd9   : > { %1937 = vmatprep.mubr.msk.bf16.mxu0 %vm2454_vm0, %v2453_v0  ;;  %1934 = vmatpush3.bf16.msra.mxu0 %v2147_v26 }
  0xda   : > { %1935 = vmatprep.subr.bf16.mxu0 %v2453_v0  ;;  %s685_s1 = sand.u32 1, %s3052_s22   ;;  %s2353_s22 = sshll.u32 %s2461_s30, 4  ;;  %s2354_s22 = int_to_ptr.vmem [resolvable:$false] %s2353_s22 }
  0xdb   : > { %s1834_s7 = sshll.u32 %s685_s1, 3  ;;  %s1660_s20 = scalar_lea.sflag [#allocation4], %s685_s1 }
  0xdc   : > { %p3057_p10 = scmp.ne.s32.totalorder %s3053_s15, 0 }
  0xdd   : > { %1936 = vmatpush3.bf16.msra.mxu0 %v2148_v27 }
  0xde   : > { %1947 = vmatprep.subr.bf16.mxu0 %v2453_v0 }
  0xe0   : > { %1938 = vmatmul.mubr.msk.bf16.vlgmr.msra.gmra.mrb[4].mxu0 %vm729_vm1, %v705_v8 }
  0xe1   : > { %1949 = vmatprep.mubr.msk.bf16.mxu0 %vm2454_vm0, %v2453_v0 }
 0x1aa   : > { %v834_v11 = vpop.f32.mrb[0].mxu1 }
 0x1ab   : > { %v1931_v13 = vpop.f32.mrb[1].mxu1  ;;  %v767_v15 = vpop.f32.mrb[0].mxu0  ;;  %v835_v16 = vadd.f32 %v1842_v10, %v834_v11 }
 0x1ac   : > { %v837_v14 = vpop.f32.mrb[2].mxu1  ;;  %v768_v19 = vadd.f32 %v1838_v12, %v767_v15  ;;  %v1923_v20 = vpop.f32.mrb[1].mxu0 }
 0x1ad   : > { %v838_v17 = vadd.f32 %v1842_v10, %v837_v14  ;;  %v1932_v18 = vpop.f32.mrb[3].mxu1  ;;  %v770_v21 = vpop.f32.mrb[2].mxu0 }
 0x1ae   : > { %v1924_v23 = vpop.f32.mrb[3].mxu0  ;;  %v773_v24 = vpack.c.bf16 %v768_v19, %v768_v19 }
 0x1af   : > { %v841_v22 = vpack.c.bf16 %v838_v17, %v835_v16 }
 0x1b1   : > { %1123 = vrot.lane.b32.xlu1 %v841_v22, %s2455_s18  ;;  %1014 = vrot.lane.b32.xlu0 %v841_v22, %s2456_s4  ;;  %v912_v25 = vsel %vm907_vm2, %v841_v22, 0 }
 0x1b2   : > { %1942 = vmatpush3.bf16.xpose.msra.mxu1 %v912_v25 }
 0x1b3   : > { %1953 = vmatprep.subr.bf16.mxu1 %v2453_v0  ;;  %v899_v43 = vpop.f32.mrb[4].mxu0 }
 0x1b4   : > { %v900_v44 = vadd.f32 %v1846_v42, %v899_v43  ;;  %v1939_v45 = vpop.f32.mrb[5].mxu0 }
 0x1b5   : > { %1121 = vrot.lane.b32.xlu1 %v773_v24, %s2455_s18  ;;  %1011 = vrot.lane.b32.xlu0 %v773_v24, %s2456_s4  ;;  %v902_v46 = vpop.f32.mrb[6].mxu0 }
 0x1b6   : > { %v903_v47 = vadd.f32 %v1846_v42, %v902_v46  ;;  %v1940_v48 = vpop.f32.mrb[7].mxu0  ;;  %v2149_v46 = vld [vmem:[#allocation10] sm:$0xff]  }
 0x1b8   : > { %v906_v49 = vpack.c.bf16 %v903_v47, %v900_v44 }
 0x1b9   : > { %1229 = vrot.lane.b32.xlu1 %v773_v24, %s2457_s19  ;;  %1231 = vrot.lane.b32.xlu0 %v841_v22, %s2457_s19 }
 0x1ba   : > { %1944 = vmatmul.mubr.msk.bf16.vlgmr.msra.gmra.mrb[4].mxu1 %vm907_vm2, %v773_v24  ;;  %1948 = vmatpush3.bf16.msra.mxu0 %v906_v49 }
 0x1bb   : > { %1955 = vmatprep.mubr.msk.bf16.mxu1 %vm2454_vm0, %v2453_v0  ;;  %1959 = vmatprep.subr.bf16.mxu0 %v2453_v0 }
 0x223   : > { %v1015_v28 = vpop.permute.xlu0 %1014  ;;  %v1124_v30 = vpop.permute.xlu1 %1123 }
 0x224   : > { %v1020_v29 = vsel %vm907_vm2, %v1015_v28, 0  ;;  %v1129_v32 = vsel %vm907_vm2, %v1124_v30, 0 }
 0x225   : > { %1954 = vmatpush3.bf16.xpose.msra.mxu1 %v1020_v29 }
 0x226   : > { %1965 = vmatprep.subr.bf16.mxu1 %v2453_v0 }
 0x227   : > { %v1012_v31 = vpop.permute.xlu0 %1011  ;;  %v1122_v34 = vpop.permute.xlu1 %1121 }
 0x22b   : > { %v1232_v33 = vpop.permute.xlu0 %1231  ;;  %v1230_v36 = vpop.permute.xlu1 %1229 }
 0x22c   : > { %1956 = vmatmul.mubr.msk.bf16.vlgmr.msra.gmra.mrb[8].mxu1 %vm907_vm2, %v1012_v31  ;;  %v1237_v35 = vsel %vm907_vm2, %v1232_v33, 0 }
 0x22d   : > { %1966 = vmatpush3.bf16.xpose.msra.mxu1 %v1129_v32  ;;  %1967 = vmatprep.mubr.msk.bf16.mxu1 %vm2454_vm0, %v2453_v0 }
 0x22e   : > { %1977 = vmatprep.subr.bf16.mxu1 %v2453_v0 }
 0x234   : > { %1968 = vmatmul.mubr.msk.bf16.vlgmr.msra.gmra.mrb[12].mxu1 %vm907_vm2, %v1122_v34 }
 0x235   : > { %1978 = vmatpush3.bf16.xpose.msra.mxu1 %v1237_v35  ;;  %1979 = vmatprep.mubr.msk.bf16.mxu1 %vm2454_vm0, %v2453_v0 }
 0x236   : > { %1989 = vmatprep.subr.bf16.mxu1 %v2453_v0 }
 0x23c   : > { %1980 = vmatmul.mubr.msk.bf16.vlgmr.msra.gmra.mrb[16].mxu1 %vm907_vm2, %v1230_v36 }
 0x23d   : > { %1993 = vmatprep.mubr.msk.bf16.mxu1 %vm2454_vm0, %v2453_v0  ;;  %1990 = vmatpush3.bf16.msra.mxu1 %v2149_v46 }
 0x23e   : > { %1991 = vmatprep.subr.bf16.mxu1 %v2453_v0 }
 0x28d   : > { %v948_v37 = vpop.f32.mrb[4].mxu1 }
 0x28e   : > { %v1945_v38 = vpop.f32.mrb[5].mxu1  ;;  %v955_v39 = vsel %vm954_vm3, %v948_v37, -inf }
 0x28f   : > { %956 = vmax.xlane.f32.xlu0 %v955_v39  ;;  %v951_v40 = vpop.f32.mrb[6].mxu1 }
 0x290   : > { %v1946_v41 = vpop.f32.mrb[7].mxu1 }
 0x2ff   : > { %v1056_v50 = vpop.f32.mrb[8].mxu1 }
 0x300   : > { %v1957_v51 = vpop.f32.mrb[9].mxu1  ;;  %v1062_v52 = vsel %vm954_vm3, %v1056_v50, -inf }
 0x301   : > { %1063 = vmax.xlane.f32.xlu1 %v1062_v52  ;;  %v1059_v53 = vpop.f32.mrb[10].mxu1  ;;  %v2150_v51 = vld [vmem:[#allocation10 + $0x8] sm:$0xff]  }
 0x302   : > { %v1958_v54 = vpop.f32.mrb[11].mxu1  ;;  %1992 = vmatpush3.bf16.msra.mxu1 %v2150_v51 }
 0x303   : > { %2005 = vmatprep.subr.bf16.mxu1 %v2453_v0 }
 0x307   : > { %v1165_v55 = vpop.f32.mrb[12].mxu1 }
 0x308   : > { %v1969_v56 = vpop.f32.mrb[13].mxu1  ;;  %v1171_v57 = vsel %vm954_vm3, %v1165_v55, -inf }
 0x309   : > { %1172 = vmax.xlane.f32.xlu0 %v1171_v57  ;;  %v1168_v58 = vpop.f32.mrb[14].mxu1 }
 0x30a   : > { %v1970_v59 = vpop.f32.mrb[15].mxu1 }
 0x30f   : > { %v1273_v60 = vpop.f32.mrb[16].mxu1 }
 0x310   : > { %v1981_v61 = vpop.f32.mrb[17].mxu1  ;;  %v1279_v62 = vsel %vm954_vm3, %v1273_v60, -inf }
 0x311   : > { %1280 = vmax.xlane.f32.xlu0 %v1279_v62  ;;  %v1276_v63 = vpop.f32.mrb[18].mxu1 }
 0x312   : > { %v1982_v1 = vpop.f32.mrb[19].mxu1 }
 0x31c   : > { %v957_v2 = vpop.xlane.xlu0 %956 }
 0x31d   : > { %v958_v3 = vsub.f32 %v948_v37, %v957_v2 }
 0x31f   : > { %v959_v4 = vmul.f32 1.442695, %v958_v3 }
 0x321   : > { %2157 = vpow2.f32 %v959_v4  ;;  %v1858_v4 = vld [vmem:[#allocation11] ss:$0 sm:$0xff] }
 0x32b   : > { %v2158_v5 = vpop.eup %2157 }
 0x32c   : > { %v961_v6 = vsel %vm954_vm3, %v2158_v5, 0.0 }
 0x32d   : > { %962 = vadd.xlane.f32.xlu1 %v961_v6 }
 0x33e   : > { %1075 = vrot.lane.b32.xlu1 %v906_v49, %s2456_s4 }
 0x38e   : > { %v1064_v8 = vpop.xlane.xlu1 %1063 }
 0x38f   : > { %v1065_v9 = vsub.f32 %v1056_v50, %v1064_v8 }
 0x391   : > { %v1066_v10 = vmul.f32 1.442695, %v1065_v9 }
 0x393   : > { %2159 = vpow2.f32 %v1066_v10 }
 0x396   : > { %v1173_v11 = vpop.xlane.xlu0 %1172 }
 0x397   : > { %v1174_v12 = vsub.f32 %v1165_v55, %v1173_v11 }
 0x399   : > { %v1175_v13 = vmul.f32 1.442695, %v1174_v12 }
 0x39b   : > { %2161 = vpow2.f32 %v1175_v13 }
 0x39d   : > { %v2160_v14 = vpop.eup %2159 }
 0x39e   : > { %v1281_v15 = vpop.xlane.xlu0 %1280  ;;  %v1068_v16 = vsel %vm954_vm3, %v2160_v14, 0.0 }
 0x39f   : > { %v1282_v17 = vsub.f32 %v1273_v60, %v1281_v15  ;;  %1069 = vadd.xlane.f32.xlu0 %v1068_v16 }
 0x3a1   : > { %v1283_v18 = vmul.f32 1.442695, %v1282_v17 }
 0x3a3   : > { %2163 = vpow2.f32 %v1283_v18  ;;  %v2151_v18 = vld [vmem:[%s2990_s12] sm:$0xff]  }
 0x3a5   : > { %v2162_v19 = vpop.eup %2161 }
 0x3a6   : > { %v1177_v20 = vsel %vm954_vm3, %v2162_v19, 0.0 }
 0x3a7   : > { %1178 = vadd.xlane.f32.xlu1 %v1177_v20 }
 0x3ad   : > { %v2164_v21 = vpop.eup %2163 }
 0x3ae   : > { %v1285_v22 = vsel %vm954_vm3, %v2164_v21, 0.0 }
 0x3af   : > { %1286 = vadd.xlane.f32.xlu0 %v1285_v22 }
 0x3b8   : > { %1291 = vrot.lane.b32.xlu1 %v906_v49, %s2457_s19 }
 0x3ba   : > { %v963_v23 = vpop.xlane.xlu1 %962 }
 0x3bb   : > { %2165 = vrcp.f32 %v963_v23  ;;  %v1862_v23 = vld [vmem:[%s2988_s10] ss:$0 sm:$0xff] }
 0x3be   : > { %v1076_v27 = vpop.permute.xlu1 %1075 }
 0x3c5   : > { %v2166_v24 = vpop.eup %2165  ;;  %1183 = vrot.lane.b32.xlu0 %v906_v49, %s2455_s18  ;;  %s687_s18 = scalar_lea.vmem [#allocation13], %s1834_s7  ;;  %s2355_s7 = scalar_lea.vmem %s2354_s22, 256 }
 0x3c6   : > { %v965_v25 = vmul.f32 %v2166_v24, %v2158_v5  ;;  %s1674_s4 = sshll.u32 %s687_s18, 4  ;;  %s2932_s4 = int_to_ptr.vmem [resolvable:$true] %s1674_s4 }
 0x3c7   : > { %p2356_p2 = scmp.lt.s32.totalorder %s2932_s4, %s2354_s22 }
 0x3c8   : > { %v966_v26 = vpack.c.bf16 %v965_v25, %v965_v25  ;;  %v1863_v25 = vld [vmem:[%s2989_s11] ss:$0 sm:$0xff] }
 0x3ca   : > { %1950 = vmatmul.mubr.msk.bf16.vlgmr.msra.gmra.mrb[8].mxu0 %vm954_vm3, %v966_v26 }
 0x3cb   : > { %1960 = vmatpush3.bf16.msra.mxu0 %v1076_v27  ;;  %1961 = vmatprep.mubr.msk.bf16.mxu0 %vm2454_vm0, %v2453_v0 }
 0x3cc   : > { %1971 = vmatprep.subr.bf16.mxu0 %v2453_v0 }
 0x42c   : > { %v1070_v28 = vpop.xlane.xlu0 %1069 }
 0x42d   : > { %2167 = vrcp.f32 %v1070_v28 }
 0x434   : > { %v1179_v29 = vpop.xlane.xlu1 %1178 }
 0x435   : > { %2169 = vrcp.f32 %v1179_v29  ;;  %v2153_v29 = vld [vmem:[%s2992_s14] sm:$0xff]  }
 0x437   : > { %v2168_v30 = vpop.eup %2167 }
 0x438   : > { %v1072_v31 = vmul.f32 %v2168_v30, %v2160_v14  ;;  %v1292_v38 = vpop.permute.xlu1 %1291  ;;  %v2154_v30 = vld [vmem:[%s2992_s14 + $0x8] sm:$0xff]  }
 0x43a   : > { %v1073_v32 = vpack.c.bf16 %v1072_v31, %v1072_v31  ;;  %v2155_v31 = vld [vmem:[%s2992_s14 + $0x10] sm:$0xff]  }
 0x43c   : > { %v1287_v33 = vpop.xlane.xlu0 %1286  ;;  %1962 = vmatmul.mubr.msk.bf16.vlgmr.msra.gmra.mrb[12].mxu0 %vm954_vm3, %v1073_v32  ;;  %v2156_v32 = vld [vmem:[%s2992_s14 + $0x18] sm:$0xff]  }
 0x43d   : > { %2171 = vrcp.f32 %v1287_v33  ;;  %1973 = vmatprep.mubr.msk.bf16.mxu0 %vm2454_vm0, %v2453_v0  ;;  %v1864_v33 = vld [vmem:[%s2991_s13] ss:$0 sm:$0xff] }
 0x43f   : > { %v2170_v34 = vpop.eup %2169 }
 0x440   : > { %v1181_v35 = vmul.f32 %v2170_v34, %v2162_v19  ;;  %v1184_v36 = vpop.permute.xlu0 %1183  ;;  %v2152_v19 = vld [vmem:[%s2990_s12 + $0x8] sm:$0xff]  }
 0x441   : > { %1972 = vmatpush3.bf16.msra.mxu0 %v1184_v36 }
 0x442   : > { %v1182_v37 = vpack.c.bf16 %v1181_v35, %v1181_v35  ;;  %1983 = vmatprep.subr.bf16.mxu0 %v2453_v0 }
 0x444   : > { %1974 = vmatmul.mubr.msk.bf16.vlgmr.msra.gmra.mrb[16].mxu0 %vm954_vm3, %v1182_v37 }
 0x445   : > { %1984 = vmatpush3.bf16.msra.mxu0 %v1292_v38  ;;  %1985 = vmatprep.mubr.msk.bf16.mxu0 %vm2454_vm0, %v2453_v0 }
 0x446   : > { %1997 = vmatprep.subr.bf16.mxu0 %v2453_v0 }
 0x447   : > { %v2172_v39 = vpop.eup %2171 }
 0x448   : > { %v1289_v40 = vmul.f32 %v2172_v39, %v2164_v21 }
 0x44a   : > { %v1290_v41 = vpack.c.bf16 %v1289_v40, %v1289_v40 }
 0x44c   : > { %1986 = vmatmul.mubr.msk.bf16.vlgmr.msra.gmra.mrb[20].mxu0 %vm954_vm3, %v1290_v41 }
 0x44d   : > { %2001 = vmatprep.mubr.msk.bf16.mxu0 %vm2454_vm0, %v2453_v0  ;;  %1998 = vmatpush3.bf16.msra.mxu0 %v2151_v18 }
 0x44e   : > { %1999 = vmatprep.subr.bf16.mxu0 %v2453_v0 }
 0x451   : > { %2000 = vmatpush3.bf16.msra.mxu0 %v2152_v19  ;;  %v1874_v19 = vld [vmem:[%s3054_s25] ss:$0 sm:$0xff] }
 0x49d   : > { %v1004_v42 = vpop.f32.mrb[8].mxu0 }
 0x49e   : > { %v1951_v43 = vpop.f32.mrb[9].mxu0 }
 0x49f   : > { %v1007_v44 = vpop.f32.mrb[10].mxu0 }
 0x4a0   : > { %v1952_v45 = vpop.f32.mrb[11].mxu0 }
 0x50f   : > { %v1115_v47 = vpop.f32.mrb[12].mxu0 }
 0x510   : > { %1338 = vrot.lane.b32.xlu1 %v1115_v47, %s2458_s2  ;;  %v1963_v48 = vpop.f32.mrb[13].mxu0 }
 0x511   : > { %v1118_v49 = vpop.f32.mrb[14].mxu0 }
 0x512   : > { %v1964_v50 = vpop.f32.mrb[15].mxu0 }
 0x517   : > { %v1223_v52 = vpop.f32.mrb[16].mxu0 }
 0x518   : > { %1342 = vrot.lane.b32.xlu0 %v1223_v52, %s2459_s21  ;;  %v1975_v53 = vpop.f32.mrb[17].mxu0  ;;  %s3056_s21 = sld [smem:[#allocation36_spill]] }
 0x519   : > { %v1226_v54 = vpop.f32.mrb[18].mxu0 }
 0x51a   : > { %v1976_v55 = vpop.f32.mrb[19].mxu0 }
 0x51f   : > { %v1331_v56 = vpop.f32.mrb[20].mxu0 }
 0x520   : > { %1346 = vrot.lane.b32.xlu1 %v1331_v56, %s2460_s26  ;;  %v1987_v57 = vpop.f32.mrb[21].mxu0  ;;  %s2930_s26 = scalar_lea.hbm %s3056_s21, %s1877_s0 }
 0x521   : > { %v1334_v58 = vpop.f32.mrb[22].mxu0 }
 0x522   : > { %v1988_v59 = vpop.f32.mrb[23].mxu0 }
 0x582   : > { %v1339_v60 = vpop.permute.xlu1 %1338 }
 0x583   : > { %v1349_v62 = vsel %vm907_vm2, %v1004_v42, %v1339_v60 }
 0x58a   : > { %v1343_v61 = vpop.permute.xlu0 %1342 }
 0x58b   : > { %v1350_v63 = vsel %vm954_vm3, %v1349_v62, %v1343_v61 }
 0x592   : > { %v1347_v1 = vpop.permute.xlu1 %1346 }
 0x593   : > { %v1352_v2 = vsel %vm1351_vm4, %v1350_v63, %v1347_v1  ;;  %v1868_v1 = vld [vmem:[%s3051_s27] ss:$0 sm:$0xff]  ;;  %s2349_s27 = scalar_lea.vmem %s2932_s4, 128 }
 0x594   : > { %v1353_v3 = vpack.c.bf16 %v1352_v2, %v1352_v2  ;;  %p2350_p1 = scmp.ne.s32.totalorder %s2932_s4, %s2349_s27  ;;  %p2357_p3 = scmp.lt.s32.totalorder %s2355_s7, %s2349_s27 }
 0x596   : > { %1994 = vmatmul.mubr.msk.bf16.vlgmr.msra.gmra.mrb[20].mxu1 %vm729_vm1, %v1353_v3  ;;  %p2351_p11 = pnand %p2350_p1, %p3057_p10  ;;  %p2358_p5 = por %p2357_p3, %p2356_p2 }
 0x597   : > { %2013 = vmatprep.mubr.msk.bf16.mxu1 %vm2454_vm0, %v2453_v0  ;;  %2006 = vmatpush3.bf16.msra.mxu1 %v2153_v29 }
 0x598   : > { %2007 = vmatprep.subr.bf16.mxu1 %v2453_v0  ;;  %p2352_p0 = pneg %p2351_p11 }
 0x59a   : > { %p2359_p6 = pnand %p2358_p5, %p2352_p0 }
 0x59b   : > { %2008 = vmatpush3.bf16.msra.mxu1 %v2154_v30 }
 0x59c   : > { %2009 = vmatprep.subr.bf16.mxu1 %v2453_v0 }
 0x59f   : > { %2010 = vmatpush3.bf16.msra.mxu1 %v2155_v31 }
 0x5a0   : > { %2011 = vmatprep.subr.bf16.mxu1 %v2453_v0 }
 0x5a3   : > { %2012 = vmatpush3.bf16.msra.mxu1 %v2156_v32 }
 0x669   : > { %v1414_v5 = vpop.f32.mrb[20].mxu1 }
 0x66a   : > { %v1415_v6 = vadd.f32 %v1858_v4, %v1414_v5  ;;  %v1995_v8 = vpop.f32.mrb[21].mxu1 }
 0x66b   : > { %v1417_v9 = vpop.f32.mrb[22].mxu1 }
 0x66c   : > { %v1996_v10 = vpop.f32.mrb[23].mxu1  ;;  %v1420_v11 = vadd.f32 %v1415_v6, %v2795_v7 }
 0x66e   : > { %v1423_v12 = vsel %vm729_vm1, %v1420_v11, 0.0 }
 0x66f   : > { %1424 = vadd.xlane.f32.xlu0 %v1423_v12 }
 0x6fc   : > { %v1425_v13 = vpop.xlane.xlu0 %1424 }
 0x6fd   : > { %v1427_v14 = vmul.f32 0.03125, %v1425_v13 }
 0x6ff   : > { %v1428_v15 = vsub.f32 %v1420_v11, %v1427_v14 }
 0x701   : > { %v1429_v16 = vmul.f32 %v1428_v15, %v1428_v15 }
 0x703   : > { %v1430_v17 = vsel %vm729_vm1, %v1429_v16, 0.0 }
 0x704   : > { %1431 = vadd.xlane.f32.xlu1 %v1430_v17 }
 0x791   : > { %v1432_v7 = vpop.xlane.xlu1 %1431 }
 0x792   : > { %v1433_v20 = vmul.f32 0.03125, %v1432_v7 }
 0x794   : > { %v1434_v21 = vadd.f32 1e-07, %v1433_v20  ;;  %v1875_v20 = vld [vmem:[%s3055_s17] ss:$0 sm:$0xff] }
 0x796   : > { %2173 = vrsqrt.f32 %v1434_v21 }
 0x7a0   : > { %v2174_v22 = vpop.eup %2173 }
 0x7a1   : > { %v1436_v24 = vmul.f32 %v2174_v22, %v1428_v15 }
 0x7a3   : > { %v1443_v26 = vmul.f32 %v1862_v23, %v1436_v24 }
 0x7a5   : > { %v1450_v27 = vadd.f32 %v1863_v25, %v1443_v26 }
 0x7a7   : > { %v1451_v28 = vpack.c.bf16 %v1450_v27, %v1450_v27 }
 0x7a9   : > { %2002 = vmatmul.mubr.msk.bf16.vlgmr.msra.gmra.mrb[24].mxu0 %vm729_vm1, %v1451_v28 }
 0x87c   : > { %v1512_v34 = vpop.f32.mrb[24].mxu0 }
 0x87d   : > { %v1513_v35 = vadd.f32 %v1864_v33, %v1512_v34  ;;  %v2003_v36 = vpop.f32.mrb[25].mxu0 }
 0x87e   : > { %v1515_v37 = vpop.f32.mrb[26].mxu0 }
 0x87f   : > { %v1519_v38 = vmul.f32 0.70710677, %v1513_v35  ;;  %v2004_v39 = vpop.f32.mrb[27].mxu0  ;;  %v1518_v60 = vmul.f32 0.5, %v1513_v35 }
 0x881   : > { %v1520_v40 = vand.u32 2147483647, %v1519_v38  ;;  %vm1539_vm5 = vcmp.ge.f32.partialorder %v1519_v38, 0.0 }
 0x883   : > { %v1521_v41 = vmul.f32 0.3275911, %v1520_v40  ;;  %v1533_v0 = vsub.f32 0.0, %v1520_v40 }
 0x885   : > { %v1522_v42 = vadd.f32 1.0, %v1521_v41  ;;  %v1534_v44 = vmul.f32 %v1533_v0, %v1520_v40 }
 0x887   : > { %2175 = vrcp.f32 %v1522_v42  ;;  %v1535_v47 = vmul.f32 1.442695, %v1534_v44 }
 0x889   : > { %2177 = vpow2.f32 %v1535_v47 }
 0x891   : > { %v2176_v43 = vpop.eup %2175 }
 0x892   : > { %v1524_v45 = vmul.f32 1.0614054, %v2176_v43 }
 0x893   : > { %v2178_v55 = vpop.eup %2177 }
 0x894   : > { %v1525_v46 = vadd.f32 -1.4531521, %v1524_v45 }
 0x896   : > { %v1526_v48 = vmul.f32 %v2176_v43, %v1525_v46 }
 0x898   : > { %v1527_v49 = vadd.f32 1.4214138, %v1526_v48 }
 0x89a   : > { %v1528_v50 = vmul.f32 %v2176_v43, %v1527_v49 }
 0x89c   : > { %v1529_v51 = vadd.f32 -0.28449672, %v1528_v50 }
 0x89e   : > { %v1530_v52 = vmul.f32 %v2176_v43, %v1529_v51 }
 0x8a0   : > { %v1531_v53 = vadd.f32 0.2548296, %v1530_v52 }
 0x8a2   : > { %v1532_v54 = vmul.f32 %v2176_v43, %v1531_v53 }
 0x8a4   : > { %v1537_v56 = vmul.f32 %v2178_v55, %v1532_v54 }
 0x8a6   : > { %v1538_v57 = vsub.f32 1.0, %v1537_v56 }
 0x8a8   : > { %v1540_v58 = vsub.f32 0.0, %v1538_v57 }
 0x8aa   : > { %v1541_v59 = vsel %vm1539_vm5, %v1538_v57, %v1540_v58 }
 0x8ab   : > { %v1542_v61 = vadd.f32 1.0, %v1541_v59 }
 0x8ad   : > { %v1543_v62 = vmul.f32 %v1542_v61, %v1518_v60 }
 0x8af   : > { %v1544_v63 = vpack.c.bf16 %v1543_v62, %v1543_v62 }
 0x8b1   : > { %2014 = vmatmul.mubr.msk.bf16.vlgmr.msra.gmra.mrb[24].mxu1 %vm1584_vm6, %v1544_v63 }
 0x984   : > { %v1622_v2 = vpop.f32.mrb[24].mxu1 }
 0x985   : > { %v1623_v3 = vadd.f32 %v1868_v1, %v1622_v2  ;;  %v2015_v4 = vpop.f32.mrb[25].mxu1 }
 0x986   : > { %v1625_v5 = vpop.f32.mrb[26].mxu1 }
 0x987   : > { %v2016_v6 = vpop.f32.mrb[27].mxu1  ;;  %v1628_v8 = vadd.f32 %v1623_v3, %v1450_v27 }
 0x989   : > { %v1631_v9 = vsel %vm729_vm1, %v1628_v8, 0.0 }
 0x98a   : > { %1632 = vadd.xlane.f32.xlu0 %v1631_v9 }
 0xa17   : > { %v1633_v10 = vpop.xlane.xlu0 %1632 }
 0xa18   : > { %v1634_v11 = vmul.f32 0.03125, %v1633_v10 }
 0xa1a   : > { %v1635_v12 = vsub.f32 %v1628_v8, %v1634_v11 }
 0xa1c   : > { %v1636_v13 = vmul.f32 %v1635_v12, %v1635_v12 }
 0xa1e   : > { %v1637_v14 = vsel %vm729_vm1, %v1636_v13, 0.0 }
 0xa1f   : > { %1638 = vadd.xlane.f32.xlu0 %v1637_v14 }
 0xaac   : > { %v1639_v15 = vpop.xlane.xlu0 %1638 }
 0xaad   : > { %v1640_v16 = vmul.f32 0.03125, %v1639_v15 }
 0xaaf   : > { %v1641_v17 = vadd.f32 1e-07, %v1640_v16 }
 0xab1   : > { %2179 = vrsqrt.f32 %v1641_v17 }
 0xabb   : > { %v2180_v18 = vpop.eup %2179 }
 0xabc   : > { %v1643_v7 = vmul.f32 %v2180_v18, %v1635_v12 }
 0xabe   : > { %v1650_v21 = vmul.f32 %v1874_v19, %v1643_v7 }
 0xac0   : > { %v1657_v22 = vadd.f32 %v1875_v20, %v1650_v21 }
 0xac2   : > { %1658 = vst.msk [vmem:[%s687_s18] sm:$0xff] %vm729_vm1, %v1657_v22 }
 0xac3   : > { %2362 = shalt.err (!%p2359_p6)
}
 0xac4   : > { %s2363_s1 = scalar_lea.hbm %s2930_s26, 128  ;;  %s2367_s25 = scalar_lea.hbm %s3056_s21, 256 }
 0xac5   : > { %p2364_p7 = scmp.ne.s32.totalorder %s2930_s26, %s2363_s1  ;;  %p2368_p4 = scmp.lt.u32.totalorder %s2930_s26, %s3056_s21 }
 0xac6   : > { %p2369_p8 = scmp.lt.u32.totalorder %s2367_s25, %s2363_s1  ;;  %p2371_p1 = scmp.lt.u32.totalorder %s2363_s1, %s2930_s26 }
 0xac7   : > { %p2365_p9 = pnand %p2364_p7, %p3057_p10 }
 0xac8   : > { %p2370_p13 = por %p2369_p8, %p2368_p4 }
 0xac9   : > { %p2366_p12 = pneg %p2365_p9 }
 0xaca   : > { %p2372_p11 = por %p2371_p1, %p2370_p13 }
 0xacc   : > { %p2373_p0 = pnand %p2372_p11, %p2366_p12 }
 0xace   : > { %2376 = shalt.err (!%p2373_p0)
}
 0xacf   : > { %2041 = dma.vmem_to_hbm [thread:$0]  (%p3057_p10), %s2932_s4, 128, %s2930_s26, %s1660_s20  }
 0xad0 PF: > { %s3058_s17 = sld [smem:[#allocation23_spill]]  ;;  %s3059_s0 = sld [smem:[#allocation19_spill]] }
 0xad1   : > { %s3060_s18 = sld [smem:[#allocation26_spill]] }
 0xad6   : > { %p2078_p2 = scmp.ge.s32.totalorder %s3058_s17, 2  ;;  %s1686_s19 = sand.u32 1, %s3059_s0  }
 0xad7   : > { %p3061_p3 = scmp.ne.s32.totalorder %s3060_s18, 0  ;;  %s1687_s2 = scalar_lea.sflag [#allocation4], %s1686_s19 }
 0xad9   : > { %p2063_p5 = pnand %p2078_p2, %p3061_p3 }
 0xadb   : > { %2418 = dma.done.wait (!%p2063_p5), %s1687_s2, 128  }
 0xadc   : > { %2420 = vsyncadd (!%p2063_p5), %s1687_s2, 4294967168  ;;  %s35_s19 = sadd.s32 1, %s3058_s17   ;;  %s3062_s27 = sld [smem:[#allocation20_spill]] }
 0xadd   : > { %p32_p6 = scmp.ge.s32.totalorder %s35_s19, 4   ;;  %s3063_s28 = sld [smem:[#allocation21_spill]] }
 0xade   : > { %s3064_s29 = sld [smem:[#allocation27_spill]]  ;;  %s3065_s30 = sld [smem:[#allocation22_spill]] }
 0xadf   : > { %s3066_s0 = sld [smem:[#allocation24_spill]]  ;;  %34 = sbr.rel (!%p32_p6) target bundleno = 18 (0x12), region = 155 }
 0xae6   :  { %1692 = vsyncpa [#allocation3], 1 }
 0xae7   :  { %1694 = vsyncpa [#allocation3 + $0x1], 1 }
 0xae8   :  { %1695 = vsyncpa [#allocation6], 1 }
 0xae9   :  { %1696 = vsyncpa [#allocation9], 1 }
 0xaea   :  { %1697 = vsyncpa [#allocation12], 1 }
 0xaeb   :  { %1698 = vsyncpa [#allocation4], 1 }
 0xaec   :  { %1700 = vsyncpa [#allocation4 + $0x1], 1 }

</bundles_post_ra>
